<compile_context>
chip_gen: v7x
topology: tpu7x:2x2x1
jax: 0.10.0
libtpu: 0.0.40
codegen_flags: <defaults>
</compile_context>

<pallas_src>
import functools
import math

import jax
import jax.numpy as jnp
from jax.experimental import pallas as pl
from jax.experimental.pallas import tpu as pltpu

# ---------------- small config consistent with Qwen2Model.__init__ ----------
VOCAB_SIZE = 128
HIDDEN = 64
NUM_HEADS = 4
NUM_KV_HEADS = 2
HEAD_DIM = 16          # hidden // num_heads
INTERMEDIATE = 128
NUM_LAYERS = 2
RMS_EPS = 1e-6
ROPE_THETA = 10000.0

KV_OUT = 2 * NUM_KV_HEADS * HEAD_DIM        # fused kv projection width
_DN_T = (((1,), (1,)), ((), ()))            # contract last-vs-last (= a @ b.T)


# ------------------------------ Pallas kernels ------------------------------
def _qwen2_layer_kernel(h_ref, cos_ref, sin_ref, sel_ref, mask_ref,
                        in_ln_ref, post_ln_ref,
                        qw_ref, qb_ref, kvw_ref, kvb_ref, ow_ref,
                        gw_ref, uw_ref, dw_ref, kv_in_ref,
                        h_out_ref, kv_out_ref,
                        *, scale, n_heads, n_kv_heads, head_dim, eps):
    f32 = jnp.float32
    h = h_ref[...]                                     # (T, H) residual stream
    T = h.shape[0]
    D = head_dim
    n_rep = n_heads // n_kv_heads
    kvd = n_kv_heads * D

    def rms(x, w):                                     # rmsnorm_fwd (f32 math)
        var = jnp.mean(x * x, axis=-1, keepdims=True)
        return x * jax.lax.rsqrt(var + eps) * w

    def mm(x, w_ref):                                  # x @ W, bf16 MXU, f32 acc
        w = w_ref[...]
        return jnp.dot(x.astype(w.dtype), w, preferred_element_type=f32)

    cos = cos_ref[...]                                 # (T, D)
    sin = sin_ref[...]

    # -------------------- attention block --------------------
    hs = rms(h, in_ln_ref[...])
    q = mm(hs, qw_ref) + qb_ref[...]                   # (T, NH*D)
    kv = mm(hs, kvw_ref) + kvb_ref[...]                # (T, 2*KVH*D)
    k = kv[:, :kvd]
    v = kv[:, kvd:]

    def rope_packed(x, nh):                            # RoPE on lane-packed heads
        outs = []
        for hh in range(nh):
            xh = x[:, hh * D:(hh + 1) * D]
            rot = jnp.concatenate([-xh[:, D // 2:], xh[:, :D // 2]], axis=-1)
            outs.append(xh * cos + rot * sin)
        return jnp.concatenate(outs, axis=-1)

    q = rope_packed(q, n_heads)
    k = rope_packed(k, n_kv_heads)

    # KV-cache writeback: kv_buffer[cur_select_index] = cat(k, v)  (flattened
    # (2*KVH, D) per token).  One-hot matmul scatter (indices are unique).
    kv_new = jnp.concatenate([k, v], axis=-1)          # (T, 2*KVH*D)
    max_t = kv_in_ref.shape[0]
    sel = sel_ref[...]                                 # (1, T) int32
    rows = jax.lax.broadcasted_iota(jnp.int32, (max_t, T), 0)
    onehot_t = (rows == sel).astype(f32)               # (max_t, T)
    scattered = jnp.dot(onehot_t, kv_new, preferred_element_type=f32)
    written = jnp.sum(onehot_t, axis=-1, keepdims=True) > 0.0
    kv_out_ref[...] = jnp.where(written, scattered, kv_in_ref[...])

    # causal (+ same-batch) attention over all heads; GQA by head-group slice.
    # NOTE: torch prefill passes qk_scale = 1/sqrt(d) * log2(e) for its exp2
    # Triton kernel; the net softmax scale is 1/sqrt(d), applied here.
    mask = mask_ref[...] != 0                          # (T, T)
    head_outs = []
    for hh in range(n_heads):
        g = hh // n_rep                                # shared kv head
        q_h = q[:, hh * D:(hh + 1) * D]
        k_g = k[:, g * D:(g + 1) * D]
        v_g = v[:, g * D:(g + 1) * D]
        s = jax.lax.dot_general(q_h, k_g, _DN_T,
                                preferred_element_type=f32) * scale
        s = jnp.where(mask, s, -1e30)
        m = jnp.max(s, axis=-1, keepdims=True)
        p = jnp.exp(s - m)
        p = p * pl.reciprocal(jnp.sum(p, axis=-1, keepdims=True), approx=True)
        head_outs.append(jnp.dot(p, v_g, preferred_element_type=f32))
    attn = jnp.concatenate(head_outs, axis=-1)         # (T, H) lane-dense
    attn = mm(attn, ow_ref)                            # o_proj (no bias)

    h = h + attn

    # -------------------- MLP block --------------------
    hs2 = rms(h, post_ln_ref[...])
    gt = mm(hs2, gw_ref)
    up = mm(hs2, uw_ref)
    act = gt * jax.nn.sigmoid(gt) * up                 # swiglu: silu(gate)*up
    h_out_ref[...] = h + mm(act, dw_ref)


def _final_kernel(h_ref, w_ref, lm_ref, o_ref, *, eps):
    h = h_ref[...]
    var = jnp.mean(h * h, axis=-1, keepdims=True)
    hs = h * jax.lax.rsqrt(var + eps) * w_ref[...]
    lm = lm_ref[...]
    o_ref[...] = jnp.dot(hs.astype(lm.dtype), lm, preferred_element_type=jnp.float32)


# ------------------------------ wrappers -------------------------------------
def qwen2_layer(h2, cos, sin, sel, attn_mask, lp, kv_cache, *, seq, scale):
    T, H = h2.shape
    kernel = functools.partial(
        _qwen2_layer_kernel, scale=scale, n_heads=NUM_HEADS,
        n_kv_heads=NUM_KV_HEADS, head_dim=HEAD_DIM, eps=RMS_EPS)
    inputs = (h2, cos, sin, sel, attn_mask,
              lp["input_ln"], lp["post_ln"],
              lp["q_wT"], lp["q_b"], lp["kv_wT"], lp["kv_b"], lp["o_wT"],
              lp["gate_wT"], lp["up_wT"], lp["down_wT"], kv_cache)
    in_specs = [pl.BlockSpec(x.shape, lambda i: (0, 0)) for x in inputs]
    out_shape = (jax.ShapeDtypeStruct((T, H), jnp.float32),
                 jax.ShapeDtypeStruct(kv_cache.shape, kv_cache.dtype))
    out_specs = (pl.BlockSpec((T, H), lambda i: (0, 0)),
                 pl.BlockSpec(kv_cache.shape, lambda i: (0, 0)))
    h_out, kv_out = pl.pallas_call(
        kernel,
        grid=(1,),
        in_specs=in_specs,
        out_specs=out_specs,
        out_shape=out_shape,
        input_output_aliases={15: 1},        # kv cache updated in place
        compiler_params=pltpu.CompilerParams(dimension_semantics=("arbitrary",)),
    )(*inputs)
    return h_out, kv_out


def final_norm_lm_head(h2, norm_w, lm_wT):
    T, H = h2.shape
    V = lm_wT.shape[1]
    return pl.pallas_call(
        functools.partial(_final_kernel, eps=RMS_EPS),
        grid=(1,),
        in_specs=[pl.BlockSpec((T, H), lambda i: (0, 0)),
                  pl.BlockSpec((1, H), lambda i: (0, 0)),
                  pl.BlockSpec((H, V), lambda i: (0, 0))],
        out_specs=pl.BlockSpec((T, V), lambda i: (0, 0)),
        out_shape=jax.ShapeDtypeStruct((T, V), jnp.float32),
        compiler_params=pltpu.CompilerParams(dimension_semantics=("arbitrary",)),
    )(h2, norm_w, lm_wT)


# ------------------------------ params ---------------------------------------
def init_params(key):
    """PyTorch-layout weights, mirroring Qwen2Model.__init__ initializers."""
    keys = jax.random.split(key, 3 + NUM_LAYERS)
    params = {
        "embed_tokens": jax.random.normal(keys[0], (VOCAB_SIZE, HIDDEN), jnp.float32),
        "norm_weight": jnp.ones((HIDDEN,), jnp.float32),
        "lm_head_weight": jax.random.uniform(keys[1], (VOCAB_SIZE, HIDDEN), jnp.float32),
    }
    kv_dim = NUM_KV_HEADS * HEAD_DIM * 2
    lim_h = 1.0 / math.sqrt(HIDDEN)
    lim_i = 1.0 / math.sqrt(INTERMEDIATE)
    layers = []
    for li in range(NUM_LAYERS):
        k = jax.random.split(keys[3 + li], 8)
        layers.append(dict(
            input_ln=jnp.ones((HIDDEN,), jnp.float32),
            post_ln=jnp.ones((HIDDEN,), jnp.float32),
            q_w=jax.random.uniform(k[0], (HIDDEN, HIDDEN), jnp.float32),
            q_b=jax.random.uniform(k[1], (HIDDEN,), jnp.float32),
            kv_w=jax.random.uniform(k[2], (kv_dim, HIDDEN), jnp.float32),
            kv_b=jax.random.uniform(k[3], (kv_dim,), jnp.float32),
            o_w=jax.random.uniform(k[4], (HIDDEN, HIDDEN), jnp.float32),
            gate_w=jax.random.uniform(k[5], (INTERMEDIATE, HIDDEN), jnp.float32, -lim_h, lim_h),
            up_w=jax.random.uniform(k[6], (INTERMEDIATE, HIDDEN), jnp.float32, -lim_h, lim_h),
            down_w=jax.random.uniform(k[7], (HIDDEN, INTERMEDIATE), jnp.float32, -lim_i, lim_i),
        ))
    params["layers"] = layers
    return params


def prepare_params(params):
    """One-time: transpose weights to [in, out] and cast MXU operands to bf16."""
    bf16 = jnp.bfloat16
    prepared = {
        "embed_tokens": params["embed_tokens"],
        "norm_weight": params["norm_weight"].reshape(1, HIDDEN),
        "lm_head_wT": params["lm_head_weight"].T.astype(bf16),      # (H, V)
    }
    layers = []
    for lp in params["layers"]:
        layers.append(dict(
            input_ln=lp["input_ln"].reshape(1, HIDDEN),
            post_ln=lp["post_ln"].reshape(1, HIDDEN),
            q_wT=lp["q_w"].T.astype(bf16),            # (H, H)
            q_b=lp["q_b"].reshape(1, HIDDEN),
            kv_wT=lp["kv_w"].T.astype(bf16),          # (H, KV_OUT)
            kv_b=lp["kv_b"].reshape(1, KV_OUT),
            o_wT=lp["o_w"].T.astype(bf16),            # (H, H)
            gate_wT=lp["gate_w"].T.astype(bf16),      # (H, I)
            up_wT=lp["up_w"].T.astype(bf16),          # (H, I)
            down_wT=lp["down_w"].T.astype(bf16),      # (I, H)
        ))
    prepared["layers"] = layers
    return prepared


# ------------------------------ forward ---------------------------------------
def qwen2_forward(params, input_ids, start_pos, kv_buffers, cur_select_index):
    """Prefill (seq_len > 1) path of Qwen2Model.forward."""
    B, S = input_ids.shape
    T = B * S
    h = params["embed_tokens"][input_ids].reshape(T, HIDDEN)   # embedding gather (XLA glue)
    qk_scale = 1.0 / math.sqrt(HEAD_DIM)                       # net softmax scale

    # rotary embedding tables per flattened (batch, seq) token
    pos = jnp.arange(start_pos, start_pos + S, dtype=jnp.float32)
    inv_freq = 1.0 / (ROPE_THETA ** (jnp.arange(0, HEAD_DIM, 2, dtype=jnp.float32) / HEAD_DIM))
    freqs = pos[:, None] * inv_freq[None, :]
    emb = jnp.concatenate([freqs, freqs], axis=-1)             # (S, D)
    cos = jnp.tile(jnp.cos(emb), (B, 1))                       # (T, D)
    sin = jnp.tile(jnp.sin(emb), (B, 1))

    # combined causal + same-batch mask for flattened tokens (built once)
    tok = jnp.arange(T, dtype=jnp.int32)
    same_b = (tok[:, None] // S) == (tok[None, :] // S)
    causal = (tok[None, :] % S) <= (tok[:, None] % S)
    attn_mask = jnp.logical_and(same_b, causal).astype(jnp.int32)   # (T, T)

    sel = cur_select_index.astype(jnp.int32).reshape(1, T)

    for li, lp in enumerate(params["layers"]):
        h, kv_buffers[li] = qwen2_layer(h, cos, sin, sel, attn_mask, lp,
                                        kv_buffers[li], seq=S, scale=qk_scale)

    logits = final_norm_lm_head(h, params["norm_weight"], params["lm_head_wT"])
    return logits.reshape(B, S, VOCAB_SIZE), kv_buffers


# ----------------------------------- main -------------------------------------
if __name__ == "__main__":
    key = jax.random.PRNGKey(0)
    pk, ik = jax.random.split(key)
    params = prepare_params(init_params(pk))

    B, S = 2, 8
    input_ids = jax.random.randint(ik, (B, S), 0, VOCAB_SIZE, dtype=jnp.int32)

    max_tokens = B * S
    # KV cache: torch layout (tokens, 2*num_kv_heads, head_dim) stored flat as
    # (tokens, 2*num_kv_heads*head_dim) — bit-identical under reshape.
    kv_buffers = [jnp.zeros((max_tokens, KV_OUT), jnp.float32)
                  for _ in range(NUM_LAYERS)]
    cur_select_index = jnp.arange(max_tokens, dtype=jnp.int32)

    logits, kv_buffers = qwen2_forward(params, input_ids, 0, kv_buffers, cur_select_index)
    logits = jax.block_until_ready(logits)

    assert logits.shape == (B, S, VOCAB_SIZE), logits.shape
    assert bool(jnp.all(jnp.isfinite(logits)))       # mirrors the torch NaN guards
    for kb in kv_buffers:
        assert kb.shape == (max_tokens, KV_OUT)
        assert bool(jnp.all(jnp.isfinite(kb)))
    print("KERNEL_OK")
</pallas_src>

<mosaic_0001>
module attributes {stable_mosaic.version = 11 : i64} {
  func.func @_qwen2_layer_kernel(%arg0: i32, %arg1: memref<16x64xf32, #tpu.memory_space<vmem>>, %arg2: memref<16x16xf32, #tpu.memory_space<vmem>>, %arg3: memref<16x16xf32, #tpu.memory_space<vmem>>, %arg4: memref<1x16xi32, #tpu.memory_space<vmem>>, %arg5: memref<16x16xi32, #tpu.memory_space<vmem>>, %arg6: memref<1x64xf32, #tpu.memory_space<vmem>>, %arg7: memref<1x64xf32, #tpu.memory_space<vmem>>, %arg8: memref<64x64xbf16, #tpu.memory_space<vmem>>, %arg9: memref<1x64xf32, #tpu.memory_space<vmem>>, %arg10: memref<64x64xbf16, #tpu.memory_space<vmem>>, %arg11: memref<1x64xf32, #tpu.memory_space<vmem>>, %arg12: memref<64x64xbf16, #tpu.memory_space<vmem>>, %arg13: memref<64x128xbf16, #tpu.memory_space<vmem>>, %arg14: memref<64x128xbf16, #tpu.memory_space<vmem>>, %arg15: memref<128x64xbf16, #tpu.memory_space<vmem>>, %arg16: memref<16x64xf32, #tpu.memory_space<vmem>>, %arg17: memref<16x64xf32, #tpu.memory_space<vmem>>, %arg18: memref<16x64xf32, #tpu.memory_space<vmem>>) attributes {dimension_semantics = [#tpu.dimension_semantics<arbitrary>], iteration_bounds = array<i64: 1>, scalar_prefetch = 0 : i64, scratch_operands = 0 : i64, tpu.core_type = #tpu.core_type<tc>, window_params = [{pipeline_mode = #tpu.pipeline_mode<synchronous>, transform_indices = @transform_0, window_bounds = array<i64: 16, 64>}, {pipeline_mode = #tpu.pipeline_mode<synchronous>, transform_indices = @transform_1, window_bounds = array<i64: 16, 16>}, {pipeline_mode = #tpu.pipeline_mode<synchronous>, transform_indices = @transform_2, window_bounds = array<i64: 16, 16>}, {pipeline_mode = #tpu.pipeline_mode<synchronous>, transform_indices = @transform_3, window_bounds = array<i64: 1, 16>}, {pipeline_mode = #tpu.pipeline_mode<synchronous>, transform_indices = @transform_4, window_bounds = array<i64: 16, 16>}, {pipeline_mode = #tpu.pipeline_mode<synchronous>, transform_indices = @transform_5, window_bounds = array<i64: 1, 64>}, {pipeline_mode = #tpu.pipeline_mode<synchronous>, transform_indices = @transform_6, window_bounds = array<i64: 1, 64>}, {pipeline_mode = #tpu.pipeline_mode<synchronous>, transform_indices = @transform_7, window_bounds = array<i64: 64, 64>}, {pipeline_mode = #tpu.pipeline_mode<synchronous>, transform_indices = @transform_8, window_bounds = array<i64: 1, 64>}, {pipeline_mode = #tpu.pipeline_mode<synchronous>, transform_indices = @transform_9, window_bounds = array<i64: 64, 64>}, {pipeline_mode = #tpu.pipeline_mode<synchronous>, transform_indices = @transform_10, window_bounds = array<i64: 1, 64>}, {pipeline_mode = #tpu.pipeline_mode<synchronous>, transform_indices = @transform_11, window_bounds = array<i64: 64, 64>}, {pipeline_mode = #tpu.pipeline_mode<synchronous>, transform_indices = @transform_12, window_bounds = array<i64: 64, 128>}, {pipeline_mode = #tpu.pipeline_mode<synchronous>, transform_indices = @transform_13, window_bounds = array<i64: 64, 128>}, {pipeline_mode = #tpu.pipeline_mode<synchronous>, transform_indices = @transform_14, window_bounds = array<i64: 128, 64>}, {pipeline_mode = #tpu.pipeline_mode<synchronous>, transform_indices = @transform_15, window_bounds = array<i64: 16, 64>}, {pipeline_mode = #tpu.pipeline_mode<synchronous>, transform_indices = @transform_16, window_bounds = array<i64: 16, 64>}, {pipeline_mode = #tpu.pipeline_mode<synchronous>, transform_indices = @transform_17, window_bounds = array<i64: 16, 64>}]} {
    %c0 = arith.constant 0 : index
    %c0_0 = arith.constant 0 : index
    %0 = vector.load %arg1[%c0, %c0_0] : memref<16x64xf32, #tpu.memory_space<vmem>>, vector<16x64xf32>
    %c0_1 = arith.constant 0 : index
    %c0_2 = arith.constant 0 : index
    %1 = vector.load %arg2[%c0_1, %c0_2] : memref<16x16xf32, #tpu.memory_space<vmem>>, vector<16x16xf32>
    %c0_3 = arith.constant 0 : index
    %c0_4 = arith.constant 0 : index
    %2 = vector.load %arg3[%c0_3, %c0_4] : memref<16x16xf32, #tpu.memory_space<vmem>>, vector<16x16xf32>
    %c0_5 = arith.constant 0 : index
    %c0_6 = arith.constant 0 : index
    %3 = vector.load %arg6[%c0_5, %c0_6] : memref<1x64xf32, #tpu.memory_space<vmem>>, vector<1x64xf32>
    %4 = arith.mulf %0, %0 : vector<16x64xf32>
    %cst = arith.constant dense<0.000000e+00> : vector<16xf32>
    %5 = vector.multi_reduction <add>, %4, %cst [1] : vector<16x64xf32> to vector<16xf32>
    %6 = vector.shape_cast %5 : vector<16xf32> to vector<16x1xf32>
    %cst_7 = arith.constant 6.400000e+01 : f32
    %7 = vector.broadcast %cst_7 : f32 to vector<16x1xf32>
    %8 = arith.divf %6, %7 : vector<16x1xf32>
    %cst_8 = arith.constant 9.99999997E-7 : f32
    %9 = vector.broadcast %cst_8 : f32 to vector<16x1xf32>
    %10 = arith.addf %8, %9 : vector<16x1xf32>
    %11 = math.rsqrt %10 : vector<16x1xf32>
    %12 = vector.broadcast %11 : vector<16x1xf32> to vector<16x64xf32>
    %13 = arith.mulf %0, %12 : vector<16x64xf32>
    %14 = vector.broadcast %3 : vector<1x64xf32> to vector<16x64xf32>
    %15 = arith.mulf %13, %14 : vector<16x64xf32>
    %c0_9 = arith.constant 0 : index
    %c0_10 = arith.constant 0 : index
    %16 = vector.load %arg8[%c0_9, %c0_10] : memref<64x64xbf16, #tpu.memory_space<vmem>>, vector<64x64xbf16>
    %17 = arith.truncf %15 : vector<16x64xf32> to vector<16x64xbf16>
    %cst_11 = arith.constant dense<0.000000e+00> : vector<16x64xf32>
    %18 = tpu.matmul %17, %16, %cst_11 {dimension_numbers = #tpu.dot_dimension_numbers<[1], [0], [0], [1], [0, 0, 1, 1], [], []>} : vector<16x64xbf16>, vector<64x64xbf16>, vector<16x64xf32> -> vector<16x64xf32>
    %c0_12 = arith.constant 0 : index
    %c0_13 = arith.constant 0 : index
    %19 = vector.load %arg9[%c0_12, %c0_13] : memref<1x64xf32, #tpu.memory_space<vmem>>, vector<1x64xf32>
    %20 = vector.broadcast %19 : vector<1x64xf32> to vector<16x64xf32>
    %21 = arith.addf %18, %20 : vector<16x64xf32>
    %c0_14 = arith.constant 0 : index
    %c0_15 = arith.constant 0 : index
    %22 = vector.load %arg10[%c0_14, %c0_15] : memref<64x64xbf16, #tpu.memory_space<vmem>>, vector<64x64xbf16>
    %23 = arith.truncf %15 : vector<16x64xf32> to vector<16x64xbf16>
    %cst_16 = arith.constant dense<0.000000e+00> : vector<16x64xf32>
    %24 = tpu.matmul %23, %22, %cst_16 {dimension_numbers = #tpu.dot_dimension_numbers<[1], [0], [0], [1], [0, 0, 1, 1], [], []>} : vector<16x64xbf16>, vector<64x64xbf16>, vector<16x64xf32> -> vector<16x64xf32>
    %c0_17 = arith.constant 0 : index
    %c0_18 = arith.constant 0 : index
    %25 = vector.load %arg11[%c0_17, %c0_18] : memref<1x64xf32, #tpu.memory_space<vmem>>, vector<1x64xf32>
    %26 = vector.broadcast %25 : vector<1x64xf32> to vector<16x64xf32>
    %27 = arith.addf %24, %26 : vector<16x64xf32>
    %28 = vector.extract_strided_slice %27 {offsets = [0, 0], sizes = [16, 32], strides = [1, 1]} : vector<16x64xf32> to vector<16x32xf32>
    %29 = vector.extract_strided_slice %27 {offsets = [0, 32], sizes = [16, 32], strides = [1, 1]} : vector<16x64xf32> to vector<16x32xf32>
    %30 = vector.extract_strided_slice %21 {offsets = [0, 0], sizes = [16, 16], strides = [1, 1]} : vector<16x64xf32> to vector<16x16xf32>
    %31 = vector.extract_strided_slice %30 {offsets = [0, 8], sizes = [16, 8], strides = [1, 1]} : vector<16x16xf32> to vector<16x8xf32>
    %cst_19 = arith.constant 0.000000e+00 : f32
    %32 = vector.broadcast %cst_19 : f32 to vector<16x8xf32>
    %33 = arith.subf %32, %31 : vector<16x8xf32>
    %34 = vector.extract_strided_slice %30 {offsets = [0, 0], sizes = [16, 8], strides = [1, 1]} : vector<16x16xf32> to vector<16x8xf32>
    %35 = tpu.concatenate %33, %34 in 1 : vector<16x8xf32>, vector<16x8xf32> -> vector<16x16xf32>
    %36 = arith.mulf %30, %1 : vector<16x16xf32>
    %37 = arith.mulf %35, %2 : vector<16x16xf32>
    %38 = arith.addf %36, %37 : vector<16x16xf32>
    %39 = vector.extract_strided_slice %21 {offsets = [0, 16], sizes = [16, 16], strides = [1, 1]} : vector<16x64xf32> to vector<16x16xf32>
    %40 = vector.extract_strided_slice %39 {offsets = [0, 8], sizes = [16, 8], strides = [1, 1]} : vector<16x16xf32> to vector<16x8xf32>
    %cst_20 = arith.constant 0.000000e+00 : f32
    %41 = vector.broadcast %cst_20 : f32 to vector<16x8xf32>
    %42 = arith.subf %41, %40 : vector<16x8xf32>
    %43 = vector.extract_strided_slice %39 {offsets = [0, 0], sizes = [16, 8], strides = [1, 1]} : vector<16x16xf32> to vector<16x8xf32>
    %44 = tpu.concatenate %42, %43 in 1 : vector<16x8xf32>, vector<16x8xf32> -> vector<16x16xf32>
    %45 = arith.mulf %39, %1 : vector<16x16xf32>
    %46 = arith.mulf %44, %2 : vector<16x16xf32>
    %47 = arith.addf %45, %46 : vector<16x16xf32>
    %48 = vector.extract_strided_slice %21 {offsets = [0, 32], sizes = [16, 16], strides = [1, 1]} : vector<16x64xf32> to vector<16x16xf32>
    %49 = vector.extract_strided_slice %48 {offsets = [0, 8], sizes = [16, 8], strides = [1, 1]} : vector<16x16xf32> to vector<16x8xf32>
    %cst_21 = arith.constant 0.000000e+00 : f32
    %50 = vector.broadcast %cst_21 : f32 to vector<16x8xf32>
    %51 = arith.subf %50, %49 : vector<16x8xf32>
    %52 = vector.extract_strided_slice %48 {offsets = [0, 0], sizes = [16, 8], strides = [1, 1]} : vector<16x16xf32> to vector<16x8xf32>
    %53 = tpu.concatenate %51, %52 in 1 : vector<16x8xf32>, vector<16x8xf32> -> vector<16x16xf32>
    %54 = arith.mulf %48, %1 : vector<16x16xf32>
    %55 = arith.mulf %53, %2 : vector<16x16xf32>
    %56 = arith.addf %54, %55 : vector<16x16xf32>
    %57 = vector.extract_strided_slice %21 {offsets = [0, 48], sizes = [16, 16], strides = [1, 1]} : vector<16x64xf32> to vector<16x16xf32>
    %58 = vector.extract_strided_slice %57 {offsets = [0, 8], sizes = [16, 8], strides = [1, 1]} : vector<16x16xf32> to vector<16x8xf32>
    %cst_22 = arith.constant 0.000000e+00 : f32
    %59 = vector.broadcast %cst_22 : f32 to vector<16x8xf32>
    %60 = arith.subf %59, %58 : vector<16x8xf32>
    %61 = vector.extract_strided_slice %57 {offsets = [0, 0], sizes = [16, 8], strides = [1, 1]} : vector<16x16xf32> to vector<16x8xf32>
    %62 = tpu.concatenate %60, %61 in 1 : vector<16x8xf32>, vector<16x8xf32> -> vector<16x16xf32>
    %63 = arith.mulf %57, %1 : vector<16x16xf32>
    %64 = arith.mulf %62, %2 : vector<16x16xf32>
    %65 = arith.addf %63, %64 : vector<16x16xf32>
    %66 = tpu.concatenate %38, %47, %56, %65 in 1 : vector<16x16xf32>, vector<16x16xf32>, vector<16x16xf32>, vector<16x16xf32> -> vector<16x64xf32>
    %67 = vector.extract_strided_slice %28 {offsets = [0, 0], sizes = [16, 16], strides = [1, 1]} : vector<16x32xf32> to vector<16x16xf32>
    %68 = vector.extract_strided_slice %67 {offsets = [0, 8], sizes = [16, 8], strides = [1, 1]} : vector<16x16xf32> to vector<16x8xf32>
    %cst_23 = arith.constant 0.000000e+00 : f32
    %69 = vector.broadcast %cst_23 : f32 to vector<16x8xf32>
    %70 = arith.subf %69, %68 : vector<16x8xf32>
    %71 = vector.extract_strided_slice %67 {offsets = [0, 0], sizes = [16, 8], strides = [1, 1]} : vector<16x16xf32> to vector<16x8xf32>
    %72 = tpu.concatenate %70, %71 in 1 : vector<16x8xf32>, vector<16x8xf32> -> vector<16x16xf32>
    %73 = arith.mulf %67, %1 : vector<16x16xf32>
    %74 = arith.mulf %72, %2 : vector<16x16xf32>
    %75 = arith.addf %73, %74 : vector<16x16xf32>
    %76 = vector.extract_strided_slice %28 {offsets = [0, 16], sizes = [16, 16], strides = [1, 1]} : vector<16x32xf32> to vector<16x16xf32>
    %77 = vector.extract_strided_slice %76 {offsets = [0, 8], sizes = [16, 8], strides = [1, 1]} : vector<16x16xf32> to vector<16x8xf32>
    %cst_24 = arith.constant 0.000000e+00 : f32
    %78 = vector.broadcast %cst_24 : f32 to vector<16x8xf32>
    %79 = arith.subf %78, %77 : vector<16x8xf32>
    %80 = vector.extract_strided_slice %76 {offsets = [0, 0], sizes = [16, 8], strides = [1, 1]} : vector<16x16xf32> to vector<16x8xf32>
    %81 = tpu.concatenate %79, %80 in 1 : vector<16x8xf32>, vector<16x8xf32> -> vector<16x16xf32>
    %82 = arith.mulf %76, %1 : vector<16x16xf32>
    %83 = arith.mulf %81, %2 : vector<16x16xf32>
    %84 = arith.addf %82, %83 : vector<16x16xf32>
    %85 = tpu.concatenate %75, %84 in 1 : vector<16x16xf32>, vector<16x16xf32> -> vector<16x32xf32>
    %86 = tpu.concatenate %85, %29 in 1 : vector<16x32xf32>, vector<16x32xf32> -> vector<16x64xf32>
    %c0_25 = arith.constant 0 : index
    %c0_26 = arith.constant 0 : index
    %87 = vector.load %arg4[%c0_25, %c0_26] : memref<1x16xi32, #tpu.memory_space<vmem>>, vector<1x16xi32>
    %88 = tpu.iota {dimensions = array<i32: 0>} : vector<16x16xi32>
    %89 = vector.broadcast %87 : vector<1x16xi32> to vector<16x16xi32>
    %90 = arith.cmpi eq, %88, %89 : vector<16x16xi32>
    %91 = arith.extui %90 : vector<16x16xi1> to vector<16x16xi32>
    %92 = arith.sitofp %91 : vector<16x16xi32> to vector<16x16xf32>
    %cst_27 = arith.constant dense<0.000000e+00> : vector<16x64xf32>
    %93 = tpu.matmul %92, %86, %cst_27 {dimension_numbers = #tpu.dot_dimension_numbers<[1], [0], [0], [1], [0, 0, 1, 1], [], []>} : vector<16x16xf32>, vector<16x64xf32>, vector<16x64xf32> -> vector<16x64xf32>
    %cst_28 = arith.constant dense<0.000000e+00> : vector<16xf32>
    %94 = vector.multi_reduction <add>, %92, %cst_28 [1] : vector<16x16xf32> to vector<16xf32>
    %95 = vector.shape_cast %94 : vector<16xf32> to vector<16x1xf32>
    %cst_29 = arith.constant 0.000000e+00 : f32
    %96 = vector.broadcast %cst_29 : f32 to vector<16x1xf32>
    %97 = arith.cmpf ogt, %95, %96 : vector<16x1xf32>
    %c0_30 = arith.constant 0 : index
    %c0_31 = arith.constant 0 : index
    %98 = vector.load %arg16[%c0_30, %c0_31] : memref<16x64xf32, #tpu.memory_space<vmem>>, vector<16x64xf32>
    %99 = vector.shape_cast %97 : vector<16x1xi1> to vector<16x1xi1>
    %100 = vector.broadcast %99 : vector<16x1xi1> to vector<16x64xi1>
    %101 = arith.select %100, %93, %98 : vector<16x64xi1>, vector<16x64xf32>
    %c0_32 = arith.constant 0 : index
    %c0_33 = arith.constant 0 : index
    %102 = vector.load %arg18[%c0_32, %c0_33] : memref<16x64xf32, #tpu.memory_space<vmem>>, vector<16x64xf32>
    tpu.vector_store %arg18[%c0_32, %c0_33], %101 {strides = array<i32>} : memref<16x64xf32, #tpu.memory_space<vmem>>, vector<16x64xf32>,
    %c0_34 = arith.constant 0 : index
    %c0_35 = arith.constant 0 : index
    %103 = vector.load %arg5[%c0_34, %c0_35] : memref<16x16xi32, #tpu.memory_space<vmem>>, vector<16x16xi32>
    %c0_i32 = arith.constant 0 : i32
    %104 = vector.broadcast %c0_i32 : i32 to vector<16x16xi32>
    %105 = arith.cmpi ne, %103, %104 : vector<16x16xi32>
    %106 = vector.extract_strided_slice %66 {offsets = [0, 0], sizes = [16, 16], strides = [1, 1]} : vector<16x64xf32> to vector<16x16xf32>
    %107 = vector.extract_strided_slice %85 {offsets = [0, 0], sizes = [16, 16], strides = [1, 1]} : vector<16x32xf32> to vector<16x16xf32>
    %108 = vector.extract_strided_slice %29 {offsets = [0, 0], sizes = [16, 16], strides = [1, 1]} : vector<16x32xf32> to vector<16x16xf32>
    %cst_36 = arith.constant dense<0.000000e+00> : vector<16x16xf32>
    %109 = tpu.matmul %106, %107, %cst_36 {dimension_numbers = #tpu.dot_dimension_numbers<[1], [1], [0], [0], [0, 0, 1, 0], [], []>} : vector<16x16xf32>, vector<16x16xf32>, vector<16x16xf32> -> vector<16x16xf32>
    %cst_37 = arith.constant 2.500000e-01 : f32
    %110 = vector.broadcast %cst_37 : f32 to vector<16x16xf32>
    %111 = arith.mulf %109, %110 : vector<16x16xf32>
    %cst_38 = arith.constant -1.000000e+30 : f32
    %112 = vector.broadcast %cst_38 : f32 to vector<16x16xf32>
    %113 = arith.select %105, %111, %112 : vector<16x16xi1>, vector<16x16xf32>
    %cst_39 = arith.constant dense<0xFF800000> : vector<16xf32>
    %114 = vector.multi_reduction <maximumf>, %113, %cst_39 [1] : vector<16x16xf32> to vector<16xf32>
    %115 = vector.shape_cast %114 : vector<16xf32> to vector<16x1xf32>
    %116 = vector.broadcast %115 : vector<16x1xf32> to vector<16x16xf32>
    %117 = arith.subf %113, %116 : vector<16x16xf32>
    %118 = math.exp %117 : vector<16x16xf32>
    %cst_40 = arith.constant dense<0.000000e+00> : vector<16xf32>
    %119 = vector.multi_reduction <add>, %118, %cst_40 [1] : vector<16x16xf32> to vector<16xf32>
    %120 = vector.shape_cast %119 : vector<16xf32> to vector<16x1xf32>
    %121 = tpu.reciprocal %120 {approx = true} : vector<16x1xf32> -> vector<16x1xf32>
    %122 = vector.broadcast %121 : vector<16x1xf32> to vector<16x16xf32>
    %123 = arith.mulf %118, %122 : vector<16x16xf32>
    %cst_41 = arith.constant dense<0.000000e+00> : vector<16x16xf32>
    %124 = tpu.matmul %123, %108, %cst_41 {dimension_numbers = #tpu.dot_dimension_numbers<[1], [0], [0], [1], [0, 0, 1, 1], [], []>} : vector<16x16xf32>, vector<16x16xf32>, vector<16x16xf32> -> vector<16x16xf32>
    %125 = vector.extract_strided_slice %66 {offsets = [0, 16], sizes = [16, 16], strides = [1, 1]} : vector<16x64xf32> to vector<16x16xf32>
    %126 = vector.extract_strided_slice %85 {offsets = [0, 0], sizes = [16, 16], strides = [1, 1]} : vector<16x32xf32> to vector<16x16xf32>
    %127 = vector.extract_strided_slice %29 {offsets = [0, 0], sizes = [16, 16], strides = [1, 1]} : vector<16x32xf32> to vector<16x16xf32>
    %cst_42 = arith.constant dense<0.000000e+00> : vector<16x16xf32>
    %128 = tpu.matmul %125, %126, %cst_42 {dimension_numbers = #tpu.dot_dimension_numbers<[1], [1], [0], [0], [0, 0, 1, 0], [], []>} : vector<16x16xf32>, vector<16x16xf32>, vector<16x16xf32> -> vector<16x16xf32>
    %cst_43 = arith.constant 2.500000e-01 : f32
    %129 = vector.broadcast %cst_43 : f32 to vector<16x16xf32>
    %130 = arith.mulf %128, %129 : vector<16x16xf32>
    %cst_44 = arith.constant -1.000000e+30 : f32
    %131 = vector.broadcast %cst_44 : f32 to vector<16x16xf32>
    %132 = arith.select %105, %130, %131 : vector<16x16xi1>, vector<16x16xf32>
    %cst_45 = arith.constant dense<0xFF800000> : vector<16xf32>
    %133 = vector.multi_reduction <maximumf>, %132, %cst_45 [1] : vector<16x16xf32> to vector<16xf32>
    %134 = vector.shape_cast %133 : vector<16xf32> to vector<16x1xf32>
    %135 = vector.broadcast %134 : vector<16x1xf32> to vector<16x16xf32>
    %136 = arith.subf %132, %135 : vector<16x16xf32>
    %137 = math.exp %136 : vector<16x16xf32>
    %cst_46 = arith.constant dense<0.000000e+00> : vector<16xf32>
    %138 = vector.multi_reduction <add>, %137, %cst_46 [1] : vector<16x16xf32> to vector<16xf32>
    %139 = vector.shape_cast %138 : vector<16xf32> to vector<16x1xf32>
    %140 = tpu.reciprocal %139 {approx = true} : vector<16x1xf32> -> vector<16x1xf32>
    %141 = vector.broadcast %140 : vector<16x1xf32> to vector<16x16xf32>
    %142 = arith.mulf %137, %141 : vector<16x16xf32>
    %cst_47 = arith.constant dense<0.000000e+00> : vector<16x16xf32>
    %143 = tpu.matmul %142, %127, %cst_47 {dimension_numbers = #tpu.dot_dimension_numbers<[1], [0], [0], [1], [0, 0, 1, 1], [], []>} : vector<16x16xf32>, vector<16x16xf32>, vector<16x16xf32> -> vector<16x16xf32>
    %144 = vector.extract_strided_slice %66 {offsets = [0, 32], sizes = [16, 16], strides = [1, 1]} : vector<16x64xf32> to vector<16x16xf32>
    %145 = vector.extract_strided_slice %85 {offsets = [0, 16], sizes = [16, 16], strides = [1, 1]} : vector<16x32xf32> to vector<16x16xf32>
    %146 = vector.extract_strided_slice %29 {offsets = [0, 16], sizes = [16, 16], strides = [1, 1]} : vector<16x32xf32> to vector<16x16xf32>
    %cst_48 = arith.constant dense<0.000000e+00> : vector<16x16xf32>
    %147 = tpu.matmul %144, %145, %cst_48 {dimension_numbers = #tpu.dot_dimension_numbers<[1], [1], [0], [0], [0, 0, 1, 0], [], []>} : vector<16x16xf32>, vector<16x16xf32>, vector<16x16xf32> -> vector<16x16xf32>
    %cst_49 = arith.constant 2.500000e-01 : f32
    %148 = vector.broadcast %cst_49 : f32 to vector<16x16xf32>
    %149 = arith.mulf %147, %148 : vector<16x16xf32>
    %cst_50 = arith.constant -1.000000e+30 : f32
    %150 = vector.broadcast %cst_50 : f32 to vector<16x16xf32>
    %151 = arith.select %105, %149, %150 : vector<16x16xi1>, vector<16x16xf32>
    %cst_51 = arith.constant dense<0xFF800000> : vector<16xf32>
    %152 = vector.multi_reduction <maximumf>, %151, %cst_51 [1] : vector<16x16xf32> to vector<16xf32>
    %153 = vector.shape_cast %152 : vector<16xf32> to vector<16x1xf32>
    %154 = vector.broadcast %153 : vector<16x1xf32> to vector<16x16xf32>
    %155 = arith.subf %151, %154 : vector<16x16xf32>
    %156 = math.exp %155 : vector<16x16xf32>
    %cst_52 = arith.constant dense<0.000000e+00> : vector<16xf32>
    %157 = vector.multi_reduction <add>, %156, %cst_52 [1] : vector<16x16xf32> to vector<16xf32>
    %158 = vector.shape_cast %157 : vector<16xf32> to vector<16x1xf32>
    %159 = tpu.reciprocal %158 {approx = true} : vector<16x1xf32> -> vector<16x1xf32>
    %160 = vector.broadcast %159 : vector<16x1xf32> to vector<16x16xf32>
    %161 = arith.mulf %156, %160 : vector<16x16xf32>
    %cst_53 = arith.constant dense<0.000000e+00> : vector<16x16xf32>
    %162 = tpu.matmul %161, %146, %cst_53 {dimension_numbers = #tpu.dot_dimension_numbers<[1], [0], [0], [1], [0, 0, 1, 1], [], []>} : vector<16x16xf32>, vector<16x16xf32>, vector<16x16xf32> -> vector<16x16xf32>
    %163 = vector.extract_strided_slice %66 {offsets = [0, 48], sizes = [16, 16], strides = [1, 1]} : vector<16x64xf32> to vector<16x16xf32>
    %164 = vector.extract_strided_slice %85 {offsets = [0, 16], sizes = [16, 16], strides = [1, 1]} : vector<16x32xf32> to vector<16x16xf32>
    %165 = vector.extract_strided_slice %29 {offsets = [0, 16], sizes = [16, 16], strides = [1, 1]} : vector<16x32xf32> to vector<16x16xf32>
    %cst_54 = arith.constant dense<0.000000e+00> : vector<16x16xf32>
    %166 = tpu.matmul %163, %164, %cst_54 {dimension_numbers = #tpu.dot_dimension_numbers<[1], [1], [0], [0], [0, 0, 1, 0], [], []>} : vector<16x16xf32>, vector<16x16xf32>, vector<16x16xf32> -> vector<16x16xf32>
    %cst_55 = arith.constant 2.500000e-01 : f32
    %167 = vector.broadcast %cst_55 : f32 to vector<16x16xf32>
    %168 = arith.mulf %166, %167 : vector<16x16xf32>
    %cst_56 = arith.constant -1.000000e+30 : f32
    %169 = vector.broadcast %cst_56 : f32 to vector<16x16xf32>
    %170 = arith.select %105, %168, %169 : vector<16x16xi1>, vector<16x16xf32>
    %cst_57 = arith.constant dense<0xFF800000> : vector<16xf32>
    %171 = vector.multi_reduction <maximumf>, %170, %cst_57 [1] : vector<16x16xf32> to vector<16xf32>
    %172 = vector.shape_cast %171 : vector<16xf32> to vector<16x1xf32>
    %173 = vector.broadcast %172 : vector<16x1xf32> to vector<16x16xf32>
    %174 = arith.subf %170, %173 : vector<16x16xf32>
    %175 = math.exp %174 : vector<16x16xf32>
    %cst_58 = arith.constant dense<0.000000e+00> : vector<16xf32>
    %176 = vector.multi_reduction <add>, %175, %cst_58 [1] : vector<16x16xf32> to vector<16xf32>
    %177 = vector.shape_cast %176 : vector<16xf32> to vector<16x1xf32>
    %178 = tpu.reciprocal %177 {approx = true} : vector<16x1xf32> -> vector<16x1xf32>
    %179 = vector.broadcast %178 : vector<16x1xf32> to vector<16x16xf32>
    %180 = arith.mulf %175, %179 : vector<16x16xf32>
    %cst_59 = arith.constant dense<0.000000e+00> : vector<16x16xf32>
    %181 = tpu.matmul %180, %165, %cst_59 {dimension_numbers = #tpu.dot_dimension_numbers<[1], [0], [0], [1], [0, 0, 1, 1], [], []>} : vector<16x16xf32>, vector<16x16xf32>, vector<16x16xf32> -> vector<16x16xf32>
    %182 = tpu.concatenate %124, %143, %162, %181 in 1 : vector<16x16xf32>, vector<16x16xf32>, vector<16x16xf32>, vector<16x16xf32> -> vector<16x64xf32>
    %c0_60 = arith.constant 0 : index
    %c0_61 = arith.constant 0 : index
    %183 = vector.load %arg12[%c0_60, %c0_61] : memref<64x64xbf16, #tpu.memory_space<vmem>>, vector<64x64xbf16>
    %184 = arith.truncf %182 : vector<16x64xf32> to vector<16x64xbf16>
    %cst_62 = arith.constant dense<0.000000e+00> : vector<16x64xf32>
    %185 = tpu.matmul %184, %183, %cst_62 {dimension_numbers = #tpu.dot_dimension_numbers<[1], [0], [0], [1], [0, 0, 1, 1], [], []>} : vector<16x64xbf16>, vector<64x64xbf16>, vector<16x64xf32> -> vector<16x64xf32>
    %186 = arith.addf %0, %185 : vector<16x64xf32>
    %c0_63 = arith.constant 0 : index
    %c0_64 = arith.constant 0 : index
    %187 = vector.load %arg7[%c0_63, %c0_64] : memref<1x64xf32, #tpu.memory_space<vmem>>, vector<1x64xf32>
    %188 = arith.mulf %186, %186 : vector<16x64xf32>
    %cst_65 = arith.constant dense<0.000000e+00> : vector<16xf32>
    %189 = vector.multi_reduction <add>, %188, %cst_65 [1] : vector<16x64xf32> to vector<16xf32>
    %190 = vector.shape_cast %189 : vector<16xf32> to vector<16x1xf32>
    %cst_66 = arith.constant 6.400000e+01 : f32
    %191 = vector.broadcast %cst_66 : f32 to vector<16x1xf32>
    %192 = arith.divf %190, %191 : vector<16x1xf32>
    %cst_67 = arith.constant 9.99999997E-7 : f32
    %193 = vector.broadcast %cst_67 : f32 to vector<16x1xf32>
    %194 = arith.addf %192, %193 : vector<16x1xf32>
    %195 = math.rsqrt %194 : vector<16x1xf32>
    %196 = vector.broadcast %195 : vector<16x1xf32> to vector<16x64xf32>
    %197 = arith.mulf %186, %196 : vector<16x64xf32>
    %198 = vector.broadcast %187 : vector<1x64xf32> to vector<16x64xf32>
    %199 = arith.mulf %197, %198 : vector<16x64xf32>
    %c0_68 = arith.constant 0 : index
    %c0_69 = arith.constant 0 : index
    %200 = vector.load %arg13[%c0_68, %c0_69] : memref<64x128xbf16, #tpu.memory_space<vmem>>, vector<64x128xbf16>
    %201 = arith.truncf %199 : vector<16x64xf32> to vector<16x64xbf16>
    %cst_70 = arith.constant dense<0.000000e+00> : vector<16x128xf32>
    %202 = tpu.matmul %201, %200, %cst_70 {dimension_numbers = #tpu.dot_dimension_numbers<[1], [0], [0], [1], [0, 0, 1, 1], [], []>} : vector<16x64xbf16>, vector<64x128xbf16>, vector<16x128xf32> -> vector<16x128xf32>
    %c0_71 = arith.constant 0 : index
    %c0_72 = arith.constant 0 : index
    %203 = vector.load %arg14[%c0_71, %c0_72] : memref<64x128xbf16, #tpu.memory_space<vmem>>, vector<64x128xbf16>
    %204 = arith.truncf %199 : vector<16x64xf32> to vector<16x64xbf16>
    %cst_73 = arith.constant dense<0.000000e+00> : vector<16x128xf32>
    %205 = tpu.matmul %204, %203, %cst_73 {dimension_numbers = #tpu.dot_dimension_numbers<[1], [0], [0], [1], [0, 0, 1, 1], [], []>} : vector<16x64xbf16>, vector<64x128xbf16>, vector<16x128xf32> -> vector<16x128xf32>
    %206 = arith.negf %202 : vector<16x128xf32>
    %207 = math.exp %206 : vector<16x128xf32>
    %cst_74 = arith.constant 1.000000e+00 : f32
    %208 = vector.broadcast %cst_74 : f32 to vector<16x128xf32>
    %209 = arith.addf %208, %207 : vector<16x128xf32>
    %210 = arith.divf %208, %209 : vector<16x128xf32>
    %211 = arith.mulf %202, %210 : vector<16x128xf32>
    %212 = arith.mulf %211, %205 : vector<16x128xf32>
    %c0_75 = arith.constant 0 : index
    %c0_76 = arith.constant 0 : index
    %213 = vector.load %arg15[%c0_75, %c0_76] : memref<128x64xbf16, #tpu.memory_space<vmem>>, vector<128x64xbf16>
    %214 = arith.truncf %212 : vector<16x128xf32> to vector<16x128xbf16>
    %cst_77 = arith.constant dense<0.000000e+00> : vector<16x64xf32>
    %215 = tpu.matmul %214, %213, %cst_77 {dimension_numbers = #tpu.dot_dimension_numbers<[1], [0], [0], [1], [0, 0, 1, 1], [], []>} : vector<16x128xbf16>, vector<128x64xbf16>, vector<16x64xf32> -> vector<16x64xf32>
    %216 = arith.addf %186, %215 : vector<16x64xf32>
    %c0_78 = arith.constant 0 : index
    %c0_79 = arith.constant 0 : index
    %217 = vector.load %arg17[%c0_78, %c0_79] : memref<16x64xf32, #tpu.memory_space<vmem>>, vector<16x64xf32>
    tpu.vector_store %arg17[%c0_78, %c0_79], %216 {strides = array<i32>} : memref<16x64xf32, #tpu.memory_space<vmem>>, vector<16x64xf32>,
    return
  }
  func.func @transform_0(%arg0: i32) -> (i32, i32) {
    %c0_i32 = arith.constant 0 : i32
    %c0_i32_0 = arith.constant 0 : i32
    %c0_i32_1 = arith.constant 0 : i32
    return %c0_i32, %c0_i32_0 : i32, i32
  }
  func.func @transform_1(%arg0: i32) -> (i32, i32) {
    %c0_i32 = arith.constant 0 : i32
    %c0_i32_0 = arith.constant 0 : i32
    %c0_i32_1 = arith.constant 0 : i32
    return %c0_i32, %c0_i32_0 : i32, i32
  }
  func.func @transform_2(%arg0: i32) -> (i32, i32) {
    %c0_i32 = arith.constant 0 : i32
    %c0_i32_0 = arith.constant 0 : i32
    %c0_i32_1 = arith.constant 0 : i32
    return %c0_i32, %c0_i32_0 : i32, i32
  }
  func.func @transform_3(%arg0: i32) -> (i32, i32) {
    %c0_i32 = arith.constant 0 : i32
    %c0_i32_0 = arith.constant 0 : i32
    %c0_i32_1 = arith.constant 0 : i32
    return %c0_i32, %c0_i32_0 : i32, i32
  }
  func.func @transform_4(%arg0: i32) -> (i32, i32) {
    %c0_i32 = arith.constant 0 : i32
    %c0_i32_0 = arith.constant 0 : i32
    %c0_i32_1 = arith.constant 0 : i32
    return %c0_i32, %c0_i32_0 : i32, i32
  }
  func.func @transform_5(%arg0: i32) -> (i32, i32) {
    %c0_i32 = arith.constant 0 : i32
    %c0_i32_0 = arith.constant 0 : i32
    %c0_i32_1 = arith.constant 0 : i32
    return %c0_i32, %c0_i32_0 : i32, i32
  }
  func.func @transform_6(%arg0: i32) -> (i32, i32) {
    %c0_i32 = arith.constant 0 : i32
    %c0_i32_0 = arith.constant 0 : i32
    %c0_i32_1 = arith.constant 0 : i32
    return %c0_i32, %c0_i32_0 : i32, i32
  }
  func.func @transform_7(%arg0: i32) -> (i32, i32) {
    %c0_i32 = arith.constant 0 : i32
    %c0_i32_0 = arith.constant 0 : i32
    %c0_i32_1 = arith.constant 0 : i32
    return %c0_i32, %c0_i32_0 : i32, i32
  }
  func.func @transform_8(%arg0: i32) -> (i32, i32) {
    %c0_i32 = arith.constant 0 : i32
    %c0_i32_0 = arith.constant 0 : i32
    %c0_i32_1 = arith.constant 0 : i32
    return %c0_i32, %c0_i32_0 : i32, i32
  }
  func.func @transform_9(%arg0: i32) -> (i32, i32) {
    %c0_i32 = arith.constant 0 : i32
    %c0_i32_0 = arith.constant 0 : i32
    %c0_i32_1 = arith.constant 0 : i32
    return %c0_i32, %c0_i32_0 : i32, i32
  }
  func.func @transform_10(%arg0: i32) -> (i32, i32) {
    %c0_i32 = arith.constant 0 : i32
    %c0_i32_0 = arith.constant 0 : i32
    %c0_i32_1 = arith.constant 0 : i32
    return %c0_i32, %c0_i32_0 : i32, i32
  }
  func.func @transform_11(%arg0: i32) -> (i32, i32) {
    %c0_i32 = arith.constant 0 : i32
    %c0_i32_0 = arith.constant 0 : i32
    %c0_i32_1 = arith.constant 0 : i32
    return %c0_i32, %c0_i32_0 : i32, i32
  }
  func.func @transform_12(%arg0: i32) -> (i32, i32) {
    %c0_i32 = arith.constant 0 : i32
    %c0_i32_0 = arith.constant 0 : i32
    %c0_i32_1 = arith.constant 0 : i32
    return %c0_i32, %c0_i32_0 : i32, i32
  }
  func.func @transform_13(%arg0: i32) -> (i32, i32) {
    %c0_i32 = arith.constant 0 : i32
    %c0_i32_0 = arith.constant 0 : i32
    %c0_i32_1 = arith.constant 0 : i32
    return %c0_i32, %c0_i32_0 : i32, i32
  }
  func.func @transform_14(%arg0: i32) -> (i32, i32) {
    %c0_i32 = arith.constant 0 : i32
    %c0_i32_0 = arith.constant 0 : i32
    %c0_i32_1 = arith.constant 0 : i32
    return %c0_i32, %c0_i32_0 : i32, i32
  }
  func.func @transform_15(%arg0: i32) -> (i32, i32) {
    %c0_i32 = arith.constant 0 : i32
    %c0_i32_0 = arith.constant 0 : i32
    %c0_i32_1 = arith.constant 0 : i32
    return %c0_i32, %c0_i32_0 : i32, i32
  }
  func.func @transform_16(%arg0: i32) -> (i32, i32) {
    %c0_i32 = arith.constant 0 : i32
    %c0_i32_0 = arith.constant 0 : i32
    %c0_i32_1 = arith.constant 0 : i32
    return %c0_i32, %c0_i32_0 : i32, i32
  }
  func.func @transform_17(%arg0: i32) -> (i32, i32) {
    %c0_i32 = arith.constant 0 : i32
    %c0_i32_0 = arith.constant 0 : i32
    %c0_i32_1 = arith.constant 0 : i32
    return %c0_i32, %c0_i32_0 : i32, i32
  }
}

</mosaic_0001>

<bundles_post_ra>
// kernel: tpu_custom_call.1
= control target key start
LH: loop header
LB: loop body
LE: loop exit
PB: predicated region body
PF: predicated region fallthrough
CT: control target
= control target key end

     0   :  { %s3298_s0 = inlined_call_operand.vmem [shape: f32[16,64], index: 0, kind: input, shape index: {}]   ;;  %s3299_s1 = inlined_call_operand.vmem [shape: f32[16,16], index: 1, kind: input, shape index: {}]   ;;  %s3300_s2 = inlined_call_operand.vmem [shape: f32[16,16], index: 2, kind: input, shape index: {}]   ;;  %s3301_s3 = inlined_call_operand.vmem [shape: s32[1,16], index: 3, kind: input, shape index: {}]   ;;  %s3302_s4 = inlined_call_operand.hbm [shape: s32[16,16], index: 4, kind: input, shape index: {}]   ;;  %s3303_s5 = inlined_call_operand.hbm [shape: f32[1,64], index: 5, kind: input, shape index: {}]   ;;  %s3304_s6 = inlined_call_operand.hbm [shape: f32[1,64], index: 6, kind: input, shape index: {}]   ;;  %s3305_s7 = inlined_call_operand.vmem [shape: bf16[64,64], index: 7, kind: input, shape index: {}]   ;;  %s3306_s8 = inlined_call_operand.hbm [shape: f32[1,64], index: 8, kind: input, shape index: {}]   ;;  %s3307_s9 = inlined_call_operand.vmem [shape: bf16[64,64], index: 9, kind: input, shape index: {}]   ;;  %s3308_s10 = inlined_call_operand.hbm [shape: f32[1,64], index: 10, kind: input, shape index: {}]   ;;  %s3309_s11 = inlined_call_operand.vmem [shape: bf16[64,64], index: 11, kind: input, shape index: {}]   ;;  %s3310_s12 = inlined_call_operand.hbm [shape: bf16[64,128], index: 12, kind: input, shape index: {}]   ;;  %s3311_s13 = inlined_call_operand.hbm [shape: bf16[64,128], index: 13, kind: input, shape index: {}]   ;;  %s3312_s14 = inlined_call_operand.vmem [shape: bf16[128,64], index: 14, kind: input, shape index: {}]   ;;  %s3313_s15 = inlined_call_operand.hbm [shape: f32[16,64], index: 15, kind: input, shape index: {}, may-alias: {15,17}]   ;;  %s3314_s16 = inlined_call_operand.hbm [shape: f32[16,64], index: 16, kind: output, shape index: {0}]   ;;  %s3315_s17 = inlined_call_operand.hbm [shape: f32[16,64], index: 17, kind: output, shape index: {1}, may-alias: {15,17}]  }
   0x1   :  { %3318 = sst [smem:[#allocation26_spill]] %s3298_s0 }
   0x2   :  { %3319 = sst [smem:[#allocation27_spill]] %s3299_s1 }
   0x3   :  { %23 = vsyncpa [#allocation3], 0 }
   0x4   :  { %24 = vsyncpa [#allocation6], 0 }
   0x5   :  { %25 = vsyncpa [#allocation9], 0 }
   0x6   :  { %26 = vsyncpa [#allocation12], 0 }
   0x7   :  { %27 = vsyncpa [#allocation15], 0 }
   0x8   :  { %28 = vsyncpa [#allocation4], 0 }
   0x9   :  { %29 = vsyncpa [#allocation18], 0  ;;  %s2595_s24 = smov [#allocation5]   ;;  %s2596_s26 = smov [#allocation8]  }
   0xa   :  { %s56_s25 = sshll.u32 %s2595_s24, 4  ;;  %s78_s27 = sshll.u32 %s2596_s26, 4  ;;  %s57_s25 = int_to_ptr.vmem [resolvable:$true] %s56_s25  ;;  %s79_s27 = int_to_ptr.vmem [resolvable:$true] %s78_s27 }
   0xb   :  { %s2361_s0 = scalar_lea.hbm %s3303_s5, 16 }
   0xc   :  { %p2362_p0 = scmp.ne.s32.totalorder %s3303_s5, %s2361_s0  ;;  %p2365_p1 = scmp.lt.u32.totalorder %s2361_s0, %s3303_s5 }
   0xe   :  { %p2367_p2 = pnand %p2365_p1, %p2362_p0 }
  0x10   :  { %2370 = shalt.err (!%p2367_p2)
}
  0x11   :  { %s2371_s20 = scalar_lea.vmem %s57_s25, 16  ;;  %s2375_s21 = scalar_lea.vmem %s57_s25, 32 }
  0x12   :  { %p2372_p3 = scmp.ne.s32.totalorder %s57_s25, %s2371_s20  ;;  %p2376_p4 = scmp.lt.s32.totalorder %s57_s25, %s57_s25 }
  0x13   :  { %p2377_p5 = scmp.lt.s32.totalorder %s2375_s21, %s2371_s20 }
  0x15   :  { %p2378_p6 = por %p2377_p5, %p2376_p4 }
  0x17   :  { %p2379_p7 = pnand %p2378_p6, %p2372_p3 }
  0x19   :  { %2382 = shalt.err (!%p2379_p7)
}
  0x1a   :  { %59 = dma.hbm_to_vmem [thread:$0]  %s3303_s5, 16, %s57_s25, [#allocation6]  }
  0x1b   :  { %s2383_s28 = scalar_lea.hbm %s3306_s8, 16 }
  0x1c   :  { %p2384_p8 = scmp.ne.s32.totalorder %s3306_s8, %s2383_s28  ;;  %p2387_p9 = scmp.lt.u32.totalorder %s2383_s28, %s3306_s8 }
  0x1e   :  { %p2389_p10 = pnand %p2387_p9, %p2384_p8 }
  0x20   :  { %2392 = shalt.err (!%p2389_p10)
}
  0x21   :  { %s2393_s19 = scalar_lea.vmem %s79_s27, 16  ;;  %s2397_s1 = scalar_lea.vmem %s79_s27, 32 }
  0x22   :  { %p2394_p11 = scmp.ne.s32.totalorder %s79_s27, %s2393_s19  ;;  %p2398_p12 = scmp.lt.s32.totalorder %s79_s27, %s79_s27 }
  0x23   :  { %p2399_p13 = scmp.lt.s32.totalorder %s2397_s1, %s2393_s19 }
  0x25   :  { %p2400_p0 = por %p2399_p13, %p2398_p12 }
  0x27   :  { %p2401_p1 = pnand %p2400_p0, %p2394_p11 }
  0x29   :  { %2404 = shalt.err (!%p2401_p1)
}
  0x2a   :  { %81 = dma.hbm_to_vmem [thread:$0]  %s3306_s8, 16, %s79_s27, [#allocation9]  }
  0x2b   :  { %s2597_s20 = smov [#allocation11]   ;;  %s2405_s24 = scalar_lea.hbm %s3310_s12, 512 }
  0x2c   :  { %s101_s21 = sshll.u32 %s2597_s20, 4  ;;  %p2406_p2 = scmp.ne.s32.totalorder %s3310_s12, %s2405_s24  ;;  %s102_s21 = int_to_ptr.vmem [resolvable:$true] %s101_s21 }
  0x2d   :  { %p2409_p3 = scmp.lt.u32.totalorder %s2405_s24, %s3310_s12 }
  0x2f   :  { %p2411_p4 = pnand %p2409_p3, %p2406_p2 }
  0x31   :  { %2414 = shalt.err (!%p2411_p4)
}
  0x32   :  { %s2415_s30 = scalar_lea.vmem %s102_s21, 512  ;;  %p2420_p6 = scmp.lt.s32.totalorder %s102_s21, %s102_s21 }
  0x33   :  { %p2416_p5 = scmp.ne.s32.totalorder %s102_s21, %s2415_s30  ;;  %p2421_p7 = scmp.lt.s32.totalorder %s2415_s30, %s2415_s30 }
  0x35   :  { %p2422_p8 = por %p2421_p7, %p2420_p6 }
  0x37   :  { %p2423_p9 = pnand %p2422_p8, %p2416_p5 }
  0x39   :  { %2426 = shalt.err (!%p2423_p9)
}
  0x3a   :  { %s2598_s8 = smov 64   ;;  %s2599_s27 = smov 4  }
  0x3b   :  { %107 = dma.hbm_to_vmem [thread:$0]  %s3310_s12, 512, %s102_s21, [#allocation12], %s2598_s8, %s2598_s8, %s2599_s27  }
  0x3c   :  { %s2600_s1 = smov [#allocation2]   ;;  %s2427_s22 = scalar_lea.hbm %s3302_s4, 256 }
  0x3d   :  { %s43_s5 = sshll.u32 %s2600_s1, 4  ;;  %p2428_p10 = scmp.ne.s32.totalorder %s3302_s4, %s2427_s22  ;;  %s44_s5 = int_to_ptr.vmem [resolvable:$true] %s43_s5 }
  0x3e   :  { %p2431_p11 = scmp.lt.u32.totalorder %s2427_s22, %s3302_s4 }
  0x40   :  { %p2433_p12 = pnand %p2431_p11, %p2428_p10 }
  0x42   :  { %2436 = shalt.err (!%p2433_p12)
}
  0x43   :  { %s2437_s29 = scalar_lea.vmem %s44_s5, 256  ;;  %p2442_p0 = scmp.lt.s32.totalorder %s44_s5, %s44_s5 }
  0x44   :  { %p2438_p13 = scmp.ne.s32.totalorder %s44_s5, %s2437_s29  ;;  %p2443_p1 = scmp.lt.s32.totalorder %s2437_s29, %s2437_s29 }
  0x46   :  { %p2444_p2 = por %p2443_p1, %p2442_p0 }
  0x48   :  { %p2445_p3 = pnand %p2444_p2, %p2438_p13 }
  0x4a   :  { %2448 = shalt.err (!%p2445_p3)
}
  0x4b   :  { %s2601_s12 = smov 128   ;;  %s2602_s21 = smov 8  }
  0x4c   :  { %49 = dma.hbm_to_vmem [thread:$0]  %s3302_s4, 256, %s44_s5, [#allocation3], %s2601_s12, %s2601_s12, %s2602_s21  }
  0x4d   :  { %s2603_s18 = smov [#allocation7]   ;;  %s2604_s1 = smov [#allocation10]  }
  0x4e   :  { %s66_s19 = sshll.u32 %s2603_s18, 4  ;;  %s90_s25 = sshll.u32 %s2604_s1, 4  ;;  %s67_s19 = int_to_ptr.vmem [resolvable:$true] %s66_s19  ;;  %s91_s25 = int_to_ptr.vmem [resolvable:$true] %s90_s25 }
  0x4f   :  { %s2449_s23 = scalar_lea.hbm %s3304_s6, 16 }
  0x50   :  { %p2450_p4 = scmp.ne.s32.totalorder %s3304_s6, %s2449_s23  ;;  %p2453_p5 = scmp.lt.u32.totalorder %s2449_s23, %s3304_s6 }
  0x52   :  { %p2455_p6 = pnand %p2453_p5, %p2450_p4 }
  0x54   :  { %2458 = shalt.err (!%p2455_p6)
}
  0x55   :  { %s2459_s4 = scalar_lea.vmem %s67_s19, 16  ;;  %s2463_s5 = scalar_lea.vmem %s67_s19, 32 }
  0x56   :  { %p2460_p7 = scmp.ne.s32.totalorder %s67_s19, %s2459_s4  ;;  %p2464_p8 = scmp.lt.s32.totalorder %s67_s19, %s67_s19 }
  0x57   :  { %p2465_p9 = scmp.lt.s32.totalorder %s2463_s5, %s2459_s4 }
  0x59   :  { %p2466_p10 = por %p2465_p9, %p2464_p8 }
  0x5b   :  { %p2467_p11 = pnand %p2466_p10, %p2460_p7 }
  0x5d   :  { %2470 = shalt.err (!%p2467_p11)
}
  0x5e   :  { %69 = dma.hbm_to_vmem [thread:$0]  %s3304_s6, 16, %s67_s19, [#allocation6]  }
  0x5f   :  { %s2471_s20 = scalar_lea.hbm %s3308_s10, 16 }
  0x60   :  { %p2472_p12 = scmp.ne.s32.totalorder %s3308_s10, %s2471_s20  ;;  %p2475_p13 = scmp.lt.u32.totalorder %s2471_s20, %s3308_s10 }
  0x62   :  { %p2477_p0 = pnand %p2475_p13, %p2472_p12 }
  0x64   :  { %2480 = shalt.err (!%p2477_p0)
}
  0x65   :  { %s2481_s28 = scalar_lea.vmem %s91_s25, 16  ;;  %s2485_s29 = scalar_lea.vmem %s91_s25, 32 }
  0x66   :  { %p2482_p1 = scmp.ne.s32.totalorder %s91_s25, %s2481_s28  ;;  %p2486_p2 = scmp.lt.s32.totalorder %s91_s25, %s91_s25 }
  0x67   :  { %p2487_p3 = scmp.lt.s32.totalorder %s2485_s29, %s2481_s28 }
  0x69   :  { %p2488_p4 = por %p2487_p3, %p2486_p2 }
  0x6b   :  { %p2489_p5 = pnand %p2488_p4, %p2482_p1 }
  0x6d   :  { %2492 = shalt.err (!%p2489_p5)
}
  0x6e   :  { %93 = dma.hbm_to_vmem [thread:$0]  %s3308_s10, 16, %s91_s25, [#allocation9]  }
  0x6f   :  { %s2605_s4 = smov [#allocation13]   ;;  %s2606_s0 = smov [#allocation14]  }
  0x70   :  { %s113_s5 = sshll.u32 %s2605_s4, 4  ;;  %s127_s30 = sshll.u32 %s2606_s0, 4  ;;  %s114_s5 = int_to_ptr.vmem [resolvable:$true] %s113_s5  ;;  %s2789_s30 = int_to_ptr.vmem [resolvable:$true] %s127_s30 }
  0x71   :  { %s2493_s20 = scalar_lea.hbm %s3311_s13, 512 }
  0x72   :  { %p2494_p6 = scmp.ne.s32.totalorder %s3311_s13, %s2493_s20  ;;  %p2497_p7 = scmp.lt.u32.totalorder %s2493_s20, %s3311_s13 }
  0x74   :  { %p2499_p8 = pnand %p2497_p7, %p2494_p6 }
  0x76   :  { %2502 = shalt.err (!%p2499_p8)
}
  0x77   :  { %s2503_s10 = scalar_lea.vmem %s114_s5, 512  ;;  %p2508_p10 = scmp.lt.s32.totalorder %s114_s5, %s114_s5 }
  0x78   :  { %p2504_p9 = scmp.ne.s32.totalorder %s114_s5, %s2503_s10  ;;  %p2509_p11 = scmp.lt.s32.totalorder %s2503_s10, %s2503_s10 }
  0x7a   :  { %p2510_p12 = por %p2509_p11, %p2508_p10 }
  0x7c   :  { %p2511_p13 = pnand %p2510_p12, %p2504_p9 }
  0x7e   :  { %2514 = shalt.err (!%p2511_p13)
}
  0x7f   :  { %119 = dma.hbm_to_vmem [thread:$0]  %s3311_s13, 512, %s114_s5, [#allocation12], %s2598_s8, %s2598_s8, %s2599_s27  }
  0x80   :  { %s2515_s19 = scalar_lea.hbm %s3313_s15, 256 }
  0x81   :  { %p2516_p0 = scmp.ne.s32.totalorder %s3313_s15, %s2515_s19  ;;  %p2519_p1 = scmp.lt.u32.totalorder %s2515_s19, %s3313_s15 }
  0x83   :  { %p2521_p2 = pnand %p2519_p1, %p2516_p0 }
  0x85   :  { %2524 = shalt.err (!%p2521_p2)
}
  0x86   :  { %s2525_s20 = scalar_lea.vmem %s2789_s30, 256  ;;  %p2530_p4 = scmp.lt.s32.totalorder %s2789_s30, %s2789_s30 }
  0x87   :  { %p2526_p3 = scmp.ne.s32.totalorder %s2789_s30, %s2525_s20  ;;  %p2531_p5 = scmp.lt.s32.totalorder %s2525_s20, %s2525_s20 }
  0x89   :  { %p2532_p6 = por %p2531_p5, %p2530_p4 }
  0x8b   :  { %p2533_p7 = pnand %p2532_p6, %p2526_p3 }
  0x8d   :  { %2536 = shalt.err (!%p2533_p7)
}
  0x8e   :  { %133 = dma.hbm_to_vmem [thread:$0]  %s3313_s15, 256, %s2789_s30, [#allocation15], %s2601_s12, %s2601_s12, %s2602_s21  }
  0x8f   :  { %2581 = dma.done.wait [#allocation3], 256  }
  0x90   :  { %2582 = vsyncadd [#allocation3], 4294967040 }
  0x91   :  { %2583 = dma.done.wait [#allocation6], 32  }
  0x92   :  { %2584 = vsyncadd [#allocation6], 4294967264 }
  0x93   :  { %2585 = dma.done.wait [#allocation9], 32  }
  0x94   :  { %2586 = vsyncadd [#allocation9], 4294967264 }
  0x95   :  { %2587 = dma.done.wait [#allocation12], 1024  }
  0x96   :  { %2588 = vsyncadd [#allocation12], 4294966272 }
  0x97   :  { %2589 = dma.done.wait [#allocation15], 256  }
  0x98   :  { %2590 = vsyncadd [#allocation15], 4294967040  ;;  %s3320_s22 = sld [smem:[#allocation26_spill]]  ;;  %vm168_vm0 = vcmask 523264   ;;  %v2283_v6 = vld [vmem:[%s3305_s7] sm:$0xff]   ;;  %v2607_v8 = vmov 0.0  }
  0x99   :  { %v2284_v7 = vld [vmem:[%s3307_s9] sm:$0xff]   ;;  %2040 = vmatprep.subr.bf16.mxu0 %v2607_v8  ;;  %2052 = vmatprep.subr.bf16.mxu1 %v2607_v8  ;;  %v2285_v9 = vld [vmem:[%s3305_s7 + $0x8] sm:$0xff]   ;;  %vm2608_vm1 = vmmov 0   ;;  %v2287_v11 = vld [vmem:[%s3305_s7 + $0x10] sm:$0xff]   ;;  %s2611_s27 = smov 104   ;;  %s2612_s5 = smov 72  }
  0x9a   :  { %2041 = vmatpush3.bf16.msra.mxu0 %v2283_v6  ;;  %2053 = vmatpush3.bf16.msra.mxu1 %v2284_v7  ;;  %v2286_v10 = vld [vmem:[%s3307_s9 + $0x8] sm:$0xff]   ;;  %v2288_v12 = vld [vmem:[%s3307_s9 + $0x10] sm:$0xff]   ;;  %v2289_v13 = vld [vmem:[%s3305_s7 + $0x18] sm:$0xff]   ;;  %s2609_s7 = smov 88   ;;  %s3321_s15 = sld [smem:[#allocation27_spill]]  ;;  %vm374_vm2 = vcmask 64512  }
  0x9b   :  { %2042 = vmatprep.subr.bf16.mxu0 %v2607_v8  ;;  %2054 = vmatprep.subr.bf16.mxu1 %v2607_v8  ;;  %v2290_v14 = vld [vmem:[%s3307_s9 + $0x18] sm:$0xff]   ;;  %v1902_v24 = vld [vmem:[#allocation5] ss:$0 sm:$0xff]  ;;  %v1903_v29 = vld [vmem:[#allocation8] ss:$0 sm:$0xff]  ;;  %s2610_s9 = smov 120  }
  0x9c   :  { %2048 = vmatprep.mubr.msk.bf16.mxu0 %vm2608_vm1, %v2607_v8  ;;  %2060 = vmatprep.mubr.msk.bf16.mxu1 %vm2608_vm1, %v2607_v8  ;;  %v1909_v42 = vld [vmem:[#allocation10] ss:$0 sm:$0xff]  ;;  %s2613_s30 = smov 16   ;;  %s2614_s25 = smov 48   ;;  %v2936_v56 = vld [vmem:[%s3300_s2 + $0x8] sm:$0xff]  ;;  %vm487_vm4 = vcmask 130048  }
  0x9d   :  { %s2615_s28 = smov 32   ;;  %v2929_v52 = vld [vmem:[%s3300_s2] sm:$0xff]  ;;  %vm490_vm6 = vcmask 261120   ;;  %vm493_vm7 = vcmask 392192   ;;  %vm3029_vm8 = vmpackc.low %vm487_vm4, %vm487_vm4  ;;  %s2617_s18 = smov 96  }
  0x9e   :  { %v159_v0 = vld [vmem:[%s3320_s22] sm:$0xff]  ;;  %v160_v1 = vld [vmem:[%s3320_s22 + $0x8] sm:$0xff]  ;;  %2043 = vmatpush3.bf16.msra.mxu0 %v2285_v9  ;;  %2055 = vmatpush3.bf16.msra.mxu1 %v2286_v10  ;;  %s2618_s1 = smov 80  }
  0x9f   :  { %v166_v2 = vmul.f32 %v159_v0, %v159_v0  ;;  %v167_v3 = vmul.f32 %v160_v1, %v160_v1  ;;  %2044 = vmatprep.subr.bf16.mxu0 %v2607_v8  ;;  %2056 = vmatprep.subr.bf16.mxu1 %v2607_v8 }
  0xa0   :  { %v2900_v45 = vld [vmem:[%s3321_s15 + $0x8] sm:$0xff]  ;;  %v2909_v47 = vld [vmem:[%s3321_s15] sm:$0xff] }
  0xa1   :  { %v169_v4 = vsel %vm168_vm0, %v166_v2, 0.0  ;;  %v172_v5 = vsel %vm168_vm0, %v167_v3, 0.0 }
  0xa2   :  { %170 = vadd.xlane.f32.xlu0 %v169_v4  ;;  %2045 = vmatpush3.bf16.msra.mxu0 %v2287_v11 }
  0xa3   :  { %2057 = vmatpush3.bf16.msra.mxu1 %v2288_v12  ;;  %2046 = vmatprep.subr.bf16.mxu0 %v2607_v8 }
  0xa4   :  { %2058 = vmatprep.subr.bf16.mxu1 %v2607_v8 }
  0xa6   :  { %173 = vadd.xlane.f32.xlu0 %v172_v5  ;;  %2047 = vmatpush3.bf16.msra.mxu0 %v2289_v13 }
  0xa7   :  { %2059 = vmatpush3.bf16.msra.mxu1 %v2290_v14  ;;  %v555_v14 = vlaneseq }
 0x12f   :  { %v171_v15 = vpop.xlane.xlu0 %170 }
 0x130   :  { %v176_v16 = vmul.f32 0.015625, %v171_v15 }
 0x132   :  { %v178_v17 = vadd.f32 1e-06, %v176_v16 }
 0x133   :  { %v174_v18 = vpop.xlane.xlu0 %173 }
 0x134   :  { %2311 = vrsqrt.f32 %v178_v17  ;;  %v177_v19 = vmul.f32 0.015625, %v174_v18  ;;  %v556_v17 = vshrl.u32 %v555_v14, 7 }
 0x136   :  { %v179_v20 = vadd.f32 1e-06, %v177_v19 }
 0x138   :  { %2313 = vrsqrt.f32 %v179_v20  ;;  %v2965_v20 = vld [vmem:[%s3301_s3] ss:$0 sm:$0xff]  ;;  %s2616_s3 = smov 112  }
 0x139   :  { %vm562_vm3 = vcmp.eq.s32.totalorder %v556_v17, %v2965_v20 }
 0x13e   :  { %v2312_v21 = vpop.eup %2311 }
 0x13f   :  { %v182_v22 = vmul.f32 %v2312_v21, %v159_v0  ;;  %v2967_v21 = vadd.s32 8, %v556_v17 }
 0x141   :  { %v190_v26 = vmul.f32 %v1902_v24, %v182_v22  ;;  %vm563_vm5 = vcmp.eq.s32.totalorder %v2967_v21, %v2965_v20 }
 0x142   :  { %v2314_v23 = vpop.eup %2313 }
 0x143   :  { %v183_v25 = vmul.f32 %v2314_v23, %v160_v1  ;;  %v2977_v23 = vsel %vm562_vm3, 1.0, %v2607_v8 }
 0x145   :  { %v191_v27 = vmul.f32 %v1902_v24, %v183_v25 }
 0x147   :  { %v200_v28 = vpack.c.bf16 %v191_v27, %v190_v26 }
 0x149   :  { %2049 = vmatmul.mubr.msk.bf16.vlgmr.msra.gmra.mrb[0].mxu0 %vm168_vm0, %v200_v28  ;;  %2061 = vmatmul.mubr.msk.bf16.vlgmr.msra.gmra.mrb[0].mxu1 %vm168_vm0, %v200_v28 }
 0x14a   :  { %2068 = vmatprep.mubr.msk.f32.mxu0 %vm487_vm4, %v2977_v23 }
 0x21c   :  { %v269_v30 = vpop.f32.mrb[0].mxu0  ;;  %v349_v31 = vpop.f32.mrb[0].mxu1 }
 0x21d   :  { %v2872_v32 = vadd.f32 %v1903_v29, %v269_v30  ;;  %v2050_v33 = vpop.f32.mrb[1].mxu0  ;;  %v2062_v34 = vpop.f32.mrb[1].mxu1  ;;  %v2904_v46 = vadd.f32 %v1909_v42, %v349_v31 }
 0x21e   :  { %v272_v35 = vpop.f32.mrb[2].mxu0  ;;  %v352_v36 = vpop.f32.mrb[2].mxu1 }
 0x21f   :  { %v2874_v37 = vadd.f32 %v1903_v29, %v272_v35  ;;  %v2063_v38 = vpop.f32.mrb[3].mxu1  ;;  %459 = vrot.lane.b32.xlu0 %v2872_v32, %s2609_s7  ;;  %389 = vrot.lane.b32.xlu1 %v2872_v32, %s2610_s9  ;;  %v2051_v39 = vpop.f32.mrb[3].mxu0  ;;  %v356_v41 = vsub.f32 0.0, %v2872_v32  ;;  %v2883_v43 = vadd.f32 %v1909_v42, %v352_v36  ;;  %v496_v48 = vsub.f32 0.0, %v2904_v46 }
 0x221   :  { %v357_v40 = vsub.f32 0.0, %v2874_v37  ;;  %v497_v44 = vsub.f32 0.0, %v2883_v43 }
 0x223   :  { %425 = vrot.lane.b32.xlu1 %v2872_v32, %s2611_s27  ;;  %385 = vrot.lane.b32.xlu0 %v357_v40, %s2611_s27 }
 0x227   :  { %383 = vrot.lane.b32.xlu1 %v356_v41, %s2611_s27  ;;  %461 = vrot.lane.b32.xlu0 %v2874_v37, %s2609_s7 }
 0x22b   :  { %391 = vrot.lane.b32.xlu1 %v2874_v37, %s2610_s9  ;;  %530 = vrot.lane.b32.xlu0 %v2883_v43, %s2610_s9 }
 0x22f   :  { %419 = vrot.lane.b32.xlu1 %v356_v41, %s2609_s7  ;;  %524 = vrot.lane.b32.xlu0 %v497_v44, %s2611_s27 }
 0x233   :  { %427 = vrot.lane.b32.xlu1 %v2874_v37, %s2611_s27  ;;  %368 = vrot.lane.b32.xlu0 %v2872_v32, %s2602_s21 }
 0x237   :  { %453 = vrot.lane.b32.xlu1 %v356_v41, %s2612_s5  ;;  %370 = vrot.lane.b32.xlu0 %v2874_v37, %s2602_s21 }
 0x23b   :  { %421 = vrot.lane.b32.xlu1 %v357_v40, %s2609_s7  ;;  %401 = vrot.lane.b32.xlu0 %v2900_v45, %s2613_s30 }
 0x23f   :  { %455 = vrot.lane.b32.xlu1 %v357_v40, %s2612_s5  ;;  %467 = vrot.lane.b32.xlu0 %v2909_v47, %s2614_s25 }
 0x243   :  { %522 = vrot.lane.b32.xlu1 %v496_v48, %s2611_s27 }
 0x247   :  { %528 = vrot.lane.b32.xlu1 %v2904_v46, %s2610_s9 }
 0x24b   :  { %360 = vrot.lane.b32.xlu1 %v356_v41, %s2610_s9 }
 0x24f   :  { %399 = vrot.lane.b32.xlu1 %v2909_v47, %s2613_s30 }
 0x253   :  { %433 = vrot.lane.b32.xlu1 %v2909_v47, %s2615_s28 }
 0x257   :  { %435 = vrot.lane.b32.xlu1 %v2900_v45, %s2615_s28 }
 0x25b   :  { %469 = vrot.lane.b32.xlu1 %v2900_v45, %s2614_s25 }
 0x25f   :  { %362 = vrot.lane.b32.xlu1 %v357_v40, %s2610_s9 }
 0x291   :  { %v390_v49 = vpop.permute.xlu1 %389  ;;  %v460_v51 = vpop.permute.xlu0 %459 }
 0x295   :  { %v426_v50 = vpop.permute.xlu1 %425  ;;  %v386_v57 = vpop.permute.xlu0 %385 }
 0x299   :  { %v384_v53 = vpop.permute.xlu1 %383  ;;  %v462_v4 = vpop.permute.xlu0 %461 }
 0x29a   :  { %v395_v54 = vsel %vm374_vm2, %v384_v53, %v390_v49 }
 0x29b   :  { %v407_v55 = vmul.f32 %v395_v54, %v2929_v52 }
 0x29d   :  { %v392_v58 = vpop.permute.xlu1 %391  ;;  %411 = vrot.lane.b32.xlu0 %v407_v55, %s2613_s30  ;;  %v531_v11 = vpop.permute.xlu0 %530 }
 0x29e   :  { %v396_v59 = vsel %vm374_vm2, %v386_v57, %v392_v58 }
 0x29f   :  { %v408_v60 = vmul.f32 %v396_v59, %v2936_v56 }
 0x2a1   :  { %v420_v61 = vpop.permute.xlu1 %419  ;;  %413 = vrot.lane.b32.xlu1 %v408_v60, %s2613_s30  ;;  %v525_v15 = vpop.permute.xlu0 %524 }
 0x2a2   :  { %v431_v62 = vsel %vm374_vm2, %v420_v61, %v426_v50  ;;  %v535_v22 = vsel %vm374_vm2, %v525_v15, %v531_v11 }
 0x2a3   :  { %v441_v63 = vmul.f32 %v431_v62, %v2929_v52  ;;  %v539_v24 = vmul.f32 %v535_v22, %v2936_v56 }
 0x2a5   :  { %v428_v0 = vpop.permute.xlu1 %427  ;;  %445 = vrot.lane.b32.xlu0 %v441_v63, %s2615_s28  ;;  %v369_v27 = vpop.permute.xlu0 %368 }
 0x2a9   :  { %v454_v1 = vpop.permute.xlu1 %453  ;;  %v371_v29 = vpop.permute.xlu0 %370 }
 0x2aa   :  { %v465_v2 = vsel %vm374_vm2, %v454_v1, %v460_v51  ;;  %v378_v1 = vmul.f32 %v2874_v37, %v2900_v45 }
 0x2ab   :  { %v475_v3 = vmul.f32 %v465_v2, %v2929_v52 }
 0x2ad   :  { %v422_v5 = vpop.permute.xlu1 %421  ;;  %479 = vrot.lane.b32.xlu1 %v475_v3, %s2614_s25  ;;  %v402_v31 = vpop.permute.xlu0 %401 }
 0x2ae   :  { %v432_v6 = vsel %vm374_vm2, %v422_v5, %v428_v0  ;;  %v406_v60 = vmul.f32 %v402_v31, %v2874_v37 }
 0x2af   :  { %v442_v7 = vmul.f32 %v432_v6, %v2936_v56 }
 0x2b1   :  { %v456_v9 = vpop.permute.xlu1 %455  ;;  %447 = vrot.lane.b32.xlu0 %v442_v7, %s2615_s28  ;;  %500 = vrot.lane.b32.xlu1 %v496_v48, %s2610_s9  ;;  %v468_v34 = vpop.permute.xlu0 %467  ;;  %v377_v48 = vmul.f32 %v2872_v32, %v2909_v47 }
 0x2b2   :  { %v466_v10 = vsel %vm374_vm2, %v456_v9, %v462_v4  ;;  %v473_v51 = vmul.f32 %v468_v34, %v2872_v32 }
 0x2b3   :  { %v476_v12 = vmul.f32 %v466_v10, %v2936_v56 }
 0x2b5   :  { %v523_v13 = vpop.permute.xlu1 %522  ;;  %508 = vrot.lane.b32.xlu1 %v2904_v46, %s2602_s21  ;;  %481 = vrot.lane.b32.xlu0 %v476_v12, %s2614_s25 }
 0x2b9   :  { %v529_v16 = vpop.permute.xlu1 %528  ;;  %502 = vrot.lane.b32.xlu0 %v497_v44, %s2610_s9 }
 0x2ba   :  { %v534_v18 = vsel %vm374_vm2, %v523_v13, %v529_v16 }
 0x2bb   :  { %v538_v19 = vmul.f32 %v534_v18, %v2929_v52  ;;  %v516_v18 = vmul.f32 %v2904_v46, %v2909_v47 }
 0x2bd   :  { %542 = vrot.lane.b32.xlu1 %v538_v19, %s2613_s30  ;;  %510 = vrot.lane.b32.xlu0 %v2883_v43, %s2602_s21  ;;  %v361_v25 = vpop.permute.xlu1 %360 }
 0x2be   :  { %v375_v36 = vsel %vm374_vm2, %v361_v25, %v369_v27  ;;  %v537_v27 = vmul.f32 %v402_v31, %v2883_v43 }
 0x2bf   :  { %v379_v39 = vmul.f32 %v375_v36, %v2929_v52  ;;  %v3051_v36 = vsel %vm563_vm5, 1.0, %v2607_v8 }
 0x2c1   :  { %544 = vrot.lane.b32.xlu0 %v539_v24, %s2613_s30  ;;  %v400_v26 = vpop.permute.xlu1 %399  ;;  %v381_v53 = vadd.f32 %v379_v39, %v377_v48  ;;  %v517_v24 = vmul.f32 %v2883_v43, %v2900_v45 }
 0x2c2   :  { %v405_v40 = vmul.f32 %v400_v26, %v2872_v32  ;;  %v536_v15 = vmul.f32 %v400_v26, %v2904_v46 }
 0x2c5   :  { %v434_v28 = vpop.permute.xlu1 %433 }
 0x2c6   :  { %v439_v42 = vmul.f32 %v434_v28, %v2872_v32 }
 0x2c9   :  { %v436_v30 = vpop.permute.xlu1 %435 }
 0x2ca   :  { %v440_v32 = vmul.f32 %v436_v30, %v2874_v37 }
 0x2cd   :  { %v470_v33 = vpop.permute.xlu1 %469 }
 0x2ce   :  { %v474_v4 = vmul.f32 %v470_v33, %v2874_v37 }
 0x2d1   :  { %v363_v38 = vpop.permute.xlu1 %362 }
 0x2d2   :  { %v376_v54 = vsel %vm374_vm2, %v363_v38, %v371_v29 }
 0x2d3   :  { %v380_v61 = vmul.f32 %v376_v54, %v2936_v56 }
 0x2d5   :  { %v382_v5 = vadd.f32 %v380_v61, %v378_v1 }
 0x30f   :  { %v412_v35 = vpop.permute.xlu0 %411 }
 0x310   :  { %v417_v49 = vadd.f32 %v412_v35, %v405_v40  ;;  %v3069_v40 = vld [vmem:[#allocation2 + $0x8] sm:$0xff] }
 0x311   :  { %vm670_vm9 = vcmp.ne.s32.totalorder %v3069_v40, 0 }
 0x312   :  { %v488_v57 = vsel %vm487_vm4, %v381_v53, %v417_v49 }
 0x313   :  { %v414_v44 = vpop.permute.xlu1 %413 }
 0x314   :  { %v418_v2 = vadd.f32 %v414_v44, %v406_v60 }
 0x316   :  { %v489_v7 = vsel %vm487_vm4, %v382_v5, %v418_v2 }
 0x317   :  { %v446_v41 = vpop.permute.xlu0 %445 }
 0x318   :  { %v451_v50 = vadd.f32 %v446_v41, %v439_v42  ;;  %v3071_v41 = vld [vmem:[#allocation2] sm:$0xff] }
 0x319   :  { %vm669_vm10 = vcmp.ne.s32.totalorder %v3071_v41, 0 }
 0x31a   :  { %v491_v59 = vsel %vm490_vm6, %v488_v57, %v451_v50 }
 0x31f   :  { %v480_v55 = vpop.permute.xlu1 %479 }
 0x320   :  { %v485_v58 = vadd.f32 %v480_v55, %v473_v51 }
 0x322   :  { %v2996_v62 = vsel %vm493_vm7, %v491_v59, %v485_v58 }
 0x323   :  { %v501_v63 = vpop.permute.xlu1 %500  ;;  %871 = vrot.lane.b32.xlu1 %v2996_v62, %s2616_s3  ;;  %v448_v0 = vpop.permute.xlu0 %447 }
 0x324   :  { %v452_v3 = vadd.f32 %v448_v0, %v440_v32 }
 0x326   :  { %v492_v11 = vsel %vm490_vm6, %v489_v7, %v452_v3 }
 0x327   :  { %v482_v6 = vpop.permute.xlu0 %481  ;;  %v509_v9 = vpop.permute.xlu1 %508 }
 0x328   :  { %v486_v10 = vadd.f32 %v482_v6, %v474_v4  ;;  %v514_v13 = vsel %vm374_vm2, %v501_v63, %v509_v9 }
 0x329   :  { %v518_v37 = vmul.f32 %v514_v13, %v2929_v52 }
 0x32a   :  { %v3007_v12 = vsel %vm493_vm7, %v492_v11, %v486_v10 }
 0x32b   :  { %873 = vrot.lane.b32.xlu0 %v3007_v12, %s2616_s3  ;;  %v503_v14 = vpop.permute.xlu0 %502  ;;  %v520_v28 = vadd.f32 %v518_v37, %v516_v18 }
 0x32f   :  { %v543_v16 = vpop.permute.xlu1 %542  ;;  %v511_v17 = vpop.permute.xlu0 %510 }
 0x330   :  { %v548_v19 = vadd.f32 %v543_v16, %v536_v15  ;;  %v515_v22 = vsel %vm374_vm2, %v503_v14, %v511_v17 }
 0x331   :  { %v519_v25 = vmul.f32 %v515_v22, %v2936_v56 }
 0x332   :  { %v3022_v52 = vsel %vm487_vm4, %v520_v28, %v548_v19 }
 0x333   :  { %v521_v29 = vadd.f32 %v519_v25, %v517_v24  ;;  %v545_v26 = vpop.permute.xlu0 %544  ;;  %v552_v56 = vsel %vm490_vm6, %v3022_v52, %v2904_v46  ;;  %v3098_v24 = vpack.i.bf16 %v2883_v43, %v2904_v46 }
 0x334   :  { %v549_v30 = vadd.f32 %v545_v26, %v537_v27 }
 0x336   :  { %v3025_v33 = vsel %vm487_vm4, %v521_v29, %v549_v30 }
 0x337   :  { %v2187_v45 = vpack.c.bf16 %v3025_v33, %v3022_v52  ;;  %v553_v31 = vsel %vm490_vm6, %v3025_v33, %v2883_v43  ;;  %v2258_v34 = vpack.i.bf16 %v3025_v33, %v3022_v52 }
 0x338   :  { %v2183_v35 = vpack.c.bf16 %v553_v31, %v552_v56 }
 0x339   :  { %2199 = vmatprep.subr.msk.bf16.mxu1 %vm3029_vm8, %v2187_v45 }
 0x33a   :  { %2184 = vmatprep.subr.bf16.mxu0 %v2183_v35  ;;  %2202 = vmatpush3.bf16.xpose.msk.msra.mxu1 %vm3029_vm8, %v2187_v45 }
 0x33b   :  { %2186 = vmatpush3.bf16.msra.mxu0 %v2183_v35 }
 0x33c   :  { %2189 = vmatprep.subr.msk.bf16.mxu0 %vm3029_vm8, %v2187_v45 }
 0x33e   :  { %2069 = vmatmul.mubr.msk.f32.vlgmr.msra.gmra.mrb[4].mxu0 %vm487_vm4, %v3051_v36 }
 0x33f   :  { %2075 = vmatprep.mubr.msk.f32.mxu0 %vm487_vm4, %v2996_v62 }
 0x344   :  { %2192 = vmatpush3.bf16.xpose.msk.msra.mxu0 %vm3029_vm8, %v2187_v45 }
 0x34b   :  { %2076 = vmatmul.mubr.msk.f32.vlgmr.msra.gmra.mrb[6].mxu0 %vm487_vm4, %v3007_v12 }
 0x395   :  { %v872_v38 = vpop.permute.xlu1 %871 }
 0x396   :  { %2089 = vmatprep.mubr.msk.f32.mxu1 %vm487_vm4, %v872_v38 }
 0x39d   :  { %v874_v20 = vpop.permute.xlu0 %873 }
 0x39e   :  { %2090 = vmatmul.mubr.msk.f32.vlgmr.msra.gmra.mrb[4].mxu1 %vm487_vm4, %v874_v20 }
 0x411   :  { %v3065_v21 = vpop.f32.mrb[4].mxu0 }
 0x412   :  { %v3067_v39 = vpop.f32.mrb[5].mxu0 }
 0x41e   :  { %v2077_v42 = vpop.f32.mrb[6].mxu0 }
 0x41f   :  { %v759_v44 = vmul.f32 0.25, %v2077_v42  ;;  %v749_v48 = vpop.f32.mrb[7].mxu0 }
 0x420   :  { %v758_v49 = vmul.f32 0.25, %v749_v48 }
 0x421   :  { %v761_v50 = vsel %vm670_vm9, %v759_v44, -1e+30 }
 0x422   :  { %v765_v51 = vsel %vm487_vm4, %v761_v50, -inf  ;;  %v760_v53 = vsel %vm669_vm10, %v758_v49, -1e+30 }
 0x423   :  { %766 = vmax.xlane.f32.xlu0 %v765_v51  ;;  %v762_v54 = vsel %vm487_vm4, %v760_v53, -inf }
 0x424   :  { %763 = vmax.xlane.f32.xlu1 %v762_v54 }
 0x471   :  { %v2091_v55 = vpop.f32.mrb[4].mxu1 }
 0x472   :  { %v955_v57 = vmul.f32 0.25, %v2091_v55  ;;  %v945_v58 = vpop.f32.mrb[5].mxu1 }
 0x473   :  { %v954_v59 = vmul.f32 0.25, %v945_v58 }
 0x474   :  { %v957_v60 = vsel %vm670_vm9, %v955_v57, -1e+30 }
 0x475   :  { %v961_v61 = vsel %vm487_vm4, %v957_v60, -inf  ;;  %v956_v32 = vsel %vm669_vm10, %v954_v59, -1e+30 }
 0x476   :  { %962 = vmax.xlane.f32.xlu1 %v961_v61  ;;  %v958_v63 = vsel %vm487_vm4, %v956_v32, -inf }
 0x477   :  { %959 = vmax.xlane.f32.xlu0 %v958_v63 }
 0x4b0   :  { %v767_v0 = vpop.xlane.xlu0 %766 }
 0x4b1   :  { %v769_v1 = vsub.f32 %v761_v50, %v767_v0  ;;  %v764_v2 = vpop.xlane.xlu1 %763 }
 0x4b2   :  { %v768_v3 = vsub.f32 %v760_v53, %v764_v2 }
 0x4b3   :  { %v772_v4 = vmul.f32 1.442695, %v769_v1 }
 0x4b4   :  { %v770_v5 = vmul.f32 1.442695, %v768_v3 }
 0x4b5   :  { %2315 = vpow2.f32 %v772_v4 }
 0x4b6   :  { %2317 = vpow2.f32 %v770_v5 }
 0x4bf   :  { %v2316_v6 = vpop.eup %2315 }
 0x4c0   :  { %v2318_v7 = vpop.eup %2317  ;;  %v777_v9 = vsel %vm487_vm4, %v2316_v6, 0.0 }
 0x4c1   :  { %778 = vadd.xlane.f32.xlu1 %v777_v9  ;;  %v774_v10 = vsel %vm487_vm4, %v2318_v7, 0.0 }
 0x4c2   :  { %775 = vadd.xlane.f32.xlu0 %v774_v10 }
 0x503   :  { %v963_v11 = vpop.xlane.xlu1 %962 }
 0x504   :  { %v965_v13 = vsub.f32 %v957_v60, %v963_v11  ;;  %v960_v14 = vpop.xlane.xlu0 %959 }
 0x505   :  { %v964_v15 = vsub.f32 %v956_v32, %v960_v14 }
 0x506   :  { %v968_v37 = vmul.f32 1.442695, %v965_v13 }
 0x507   :  { %v966_v16 = vmul.f32 1.442695, %v964_v15 }
 0x508   :  { %2319 = vpow2.f32 %v968_v37 }
 0x509   :  { %2321 = vpow2.f32 %v966_v16 }
 0x512   :  { %v2320_v17 = vpop.eup %2319 }
 0x513   :  { %v2322_v18 = vpop.eup %2321  ;;  %v973_v19 = vsel %vm487_vm4, %v2320_v17, 0.0 }
 0x514   :  { %974 = vadd.xlane.f32.xlu1 %v973_v19  ;;  %v970_v22 = vsel %vm487_vm4, %v2322_v18, 0.0 }
 0x515   :  { %971 = vadd.xlane.f32.xlu0 %v970_v22 }
 0x525   :  { %2259 = vrot.lane.b32.xlu1 %v2258_v34, %s2616_s3 }
 0x529   :  { %1061 = vrot.lane.b32.xlu1 %v2996_v62, %s2617_s18 }
 0x52b   :  { %2254 = vrot.lane.b32.xlu0 %v3098_v24, %s2617_s18 }
 0x52f   :  { %1063 = vrot.lane.b32.xlu0 %v3007_v12, %s2617_s18 }
 0x54e   :  { %v779_v29 = vpop.xlane.xlu1 %778 }
 0x54f   :  { %v776_v25 = vpop.xlane.xlu0 %775 }
 0x550   :  { %2323 = vrcp.f32 %v776_v25 }
 0x551   :  { %2325 = vrcp.f32 %v779_v29 }
 0x55a   :  { %v2324_v27 = vpop.eup %2323 }
 0x55b   :  { %v782_v28 = vmul.f32 %v2324_v27, %v2318_v7  ;;  %v2326_v56 = vpop.eup %2325 }
 0x55c   :  { %v783_v38 = vmul.f32 %v2326_v56, %v2316_v6 }
 0x55d   :  { %2082 = vmatprep.mubr.msk.f32.mxu0 %vm487_vm4, %v782_v28 }
 0x5a1   :  { %v975_v26 = vpop.xlane.xlu1 %974 }
 0x5a2   :  { %v972_v52 = vpop.xlane.xlu0 %971 }
 0x5a3   :  { %2327 = vrcp.f32 %v972_v52 }
 0x5a4   :  { %2329 = vrcp.f32 %v975_v26 }
 0x5a5   :  { %v2260_v46 = vpop.permute.xlu1 %2259 }
 0x5a6   :  { %v2255_v30 = vpop.permute.xlu0 %2254  ;;  %v2262_v31 = vunpack.i.h.bf16 %v2260_v46  ;;  %v2261_v34 = vunpack.i.l.bf16 %v2260_v46 }
 0x5a7   :  { %v2257_v33 = vunpack.i.h.bf16 %v2255_v30  ;;  %v2256_v43 = vunpack.i.l.bf16 %v2255_v30 }
 0x5a8   :  { %v3103_v44 = vpack.c.bf16 %v2262_v31, %v2261_v34 }
 0x5a9   :  { %v2193_v45 = vpack.c.bf16 %v2257_v33, %v2256_v43  ;;  %v1062_v49 = vpop.permute.xlu1 %1061 }
 0x5aa   :  { %v1064_v50 = vpop.permute.xlu0 %1063 }
 0x5ab   :  { %2194 = vmatprep.subr.bf16.mxu0 %v2193_v45 }
 0x5ac   :  { %2196 = vmatpush3.bf16.msra.mxu0 %v2193_v45 }
 0x5ad   :  { %v2328_v35 = vpop.eup %2327  ;;  %2204 = vmatprep.subr.bf16.mxu0 %v2193_v45 }
 0x5ae   :  { %v2330_v20 = vpop.eup %2329  ;;  %v978_v42 = vmul.f32 %v2328_v35, %v2322_v18 }
 0x5af   :  { %2083 = vmatmul.mubr.msk.f32.vlgmr.msra.gmra.mrb[8].mxu0 %vm487_vm4, %v783_v38  ;;  %v979_v48 = vmul.f32 %v2330_v20, %v2320_v17 }
 0x5b0   :  { %2206 = vmatpush3.bf16.msra.mxu0 %v2193_v45  ;;  %2096 = vmatprep.mubr.msk.f32.mxu0 %vm487_vm4, %v978_v42 }
 0x5b1   :  { %2209 = vmatprep.subr.msk.bf16.mxu0 %vm3029_vm8, %v3103_v44 }
 0x5b3   :  { %2097 = vmatmul.mubr.msk.f32.vlgmr.msra.gmra.mrb[10].mxu0 %vm487_vm4, %v979_v48 }
 0x5b4   :  { %2103 = vmatprep.mubr.msk.f32.mxu0 %vm487_vm4, %v1062_v49 }
 0x5b9   :  { %2212 = vmatpush3.bf16.xpose.msk.msra.mxu0 %vm3029_vm8, %v3103_v44 }
 0x5c0   :  { %2104 = vmatmul.mubr.msk.f32.vlgmr.msra.gmra.mrb[12].mxu0 %vm487_vm4, %v1064_v50 }
 0x682   :  { %v3116_v51 = vpop.f32.mrb[8].mxu0 }
 0x683   :  { %v3118_v53 = vpop.f32.mrb[9].mxu0 }
 0x686   :  { %v3120_v54 = vpop.f32.mrb[10].mxu0 }
 0x687   :  { %v3122_v55 = vpop.f32.mrb[11].mxu0 }
 0x688   :  { %v2268_v57 = vpack.i.bf16 %v3120_v54, %v3122_v55 }
 0x693   :  { %v2105_v58 = vpop.f32.mrb[12].mxu0 }
 0x694   :  { %v1153_v59 = vmul.f32 0.25, %v2105_v58  ;;  %v1143_v60 = vpop.f32.mrb[13].mxu0  ;;  %v2291_v58 = vld [vmem:[%s3309_s11] sm:$0xff]  }
 0x695   :  { %v1152_v61 = vmul.f32 0.25, %v1143_v60  ;;  %v2293_v60 = vld [vmem:[%s3309_s11 + $0x10] sm:$0xff]  }
 0x696   :  { %v1155_v32 = vsel %vm670_vm9, %v1153_v59, -1e+30  ;;  %v2292_v59 = vld [vmem:[%s3309_s11 + $0x8] sm:$0xff]  }
 0x697   :  { %v1159_v63 = vsel %vm487_vm4, %v1155_v32, -inf  ;;  %v1154_v0 = vsel %vm669_vm10, %v1152_v61, -1e+30  ;;  %v2294_v61 = vld [vmem:[%s3309_s11 + $0x18] sm:$0xff]  }
 0x698   :  { %1160 = vmax.xlane.f32.xlu0 %v1159_v63  ;;  %v1156_v1 = vsel %vm487_vm4, %v1154_v0, -inf }
 0x699   :  { %1157 = vmax.xlane.f32.xlu1 %v1156_v1 }
 0x725   :  { %v1161_v2 = vpop.xlane.xlu0 %1160 }
 0x726   :  { %v1163_v3 = vsub.f32 %v1155_v32, %v1161_v2  ;;  %v1158_v4 = vpop.xlane.xlu1 %1157 }
 0x727   :  { %v1162_v5 = vsub.f32 %v1154_v0, %v1158_v4 }
 0x728   :  { %v1166_v6 = vmul.f32 1.442695, %v1163_v3 }
 0x729   :  { %v1164_v7 = vmul.f32 1.442695, %v1162_v5 }
 0x72a   :  { %2331 = vpow2.f32 %v1166_v6 }
 0x72b   :  { %2333 = vpow2.f32 %v1164_v7 }
 0x734   :  { %v2332_v9 = vpop.eup %2331 }
 0x735   :  { %v2334_v10 = vpop.eup %2333  ;;  %v1171_v11 = vsel %vm487_vm4, %v2332_v9, 0.0 }
 0x736   :  { %1172 = vadd.xlane.f32.xlu1 %v1171_v11  ;;  %v1168_v13 = vsel %vm487_vm4, %v2334_v10, 0.0 }
 0x737   :  { %1169 = vadd.xlane.f32.xlu0 %v1168_v13 }
 0x747   :  { %1265 = vrot.lane.b32.xlu1 %v2996_v62, %s2618_s1 }
 0x74b   :  { %1267 = vrot.lane.b32.xlu1 %v3007_v12, %s2618_s1 }
 0x74d   :  { %2264 = vrot.lane.b32.xlu0 %v3098_v24, %s2618_s1 }
 0x7c3   :  { %v1173_v14 = vpop.xlane.xlu1 %1172 }
 0x7c4   :  { %2335 = vrcp.f32 %v1173_v14  ;;  %v1170_v15 = vpop.xlane.xlu0 %1169 }
 0x7c5   :  { %2337 = vrcp.f32 %v1170_v15 }
 0x7c7   :  { %v1266_v24 = vpop.permute.xlu1 %1265 }
 0x7c8   :  { %v2265_v37 = vpop.permute.xlu0 %2264 }
 0x7c9   :  { %v2267_v16 = vunpack.i.h.bf16 %v2265_v37  ;;  %v2266_v17 = vunpack.i.l.bf16 %v2265_v37 }
 0x7cb   :  { %v2213_v18 = vpack.c.bf16 %v2267_v16, %v2266_v17  ;;  %v1268_v25 = vpop.permute.xlu1 %1267 }
 0x7cd   :  { %2214 = vmatprep.subr.bf16.mxu1 %v2213_v18  ;;  %2224 = vmatprep.subr.bf16.mxu0 %v2213_v18 }
 0x7ce   :  { %v2336_v19 = vpop.eup %2335  ;;  %2216 = vmatpush3.bf16.msra.mxu1 %v2213_v18  ;;  %2226 = vmatpush3.bf16.msra.mxu0 %v2213_v18 }
 0x7cf   :  { %v2338_v22 = vpop.eup %2337  ;;  %2219 = vmatprep.subr.msk.bf16.mxu1 %vm3029_vm8, %v3103_v44  ;;  %2127 = vmatprep.subr.bf16.mxu0 %v2607_v8  ;;  %v1177_v12 = vmul.f32 %v2336_v19, %v2332_v9 }
 0x7d0   :  { %v1176_v62 = vmul.f32 %v2338_v22, %v2334_v10 }
 0x7d2   :  { %2110 = vmatprep.mubr.msk.f32.mxu1 %vm487_vm4, %v1176_v62  ;;  %v2360_v62 = vld [vmem:[%s3320_s22 + $0x8] sm:$0xff] }
 0x7d3   :  { %2111 = vmatmul.mubr.msk.f32.vlgmr.msra.gmra.mrb[6].mxu1 %vm487_vm4, %v1177_v12 }
 0x7d4   :  { %2117 = vmatprep.mubr.msk.f32.mxu1 %vm487_vm4, %v1266_v24 }
 0x7d7   :  { %2222 = vmatpush3.bf16.xpose.msk.msra.mxu1 %vm3029_vm8, %v3103_v44 }
 0x7d8   :  { %2139 = vmatprep.subr.bf16.mxu1 %v2607_v8 }
 0x7de   :  { %2118 = vmatmul.mubr.msk.f32.vlgmr.msra.gmra.mrb[8].mxu1 %vm487_vm4, %v1268_v25 }
 0x7df   :  { %2147 = vmatprep.mubr.msk.bf16.mxu1 %vm2608_vm1, %v2607_v8 }
 0x8a6   :  { %v2112_v27 = vpop.f32.mrb[6].mxu1 }
 0x8a7   :  { %v1256_v28 = vpop.f32.mrb[7].mxu1 }
 0x8a8   :  { %v2273_v29 = vpack.i.bf16 %v2112_v27, %v1256_v28 }
 0x8b1   :  { %v2119_v26 = vpop.f32.mrb[8].mxu1 }
 0x8b2   :  { %v1349_v52 = vmul.f32 0.25, %v2119_v26  ;;  %v1339_v30 = vpop.f32.mrb[9].mxu1  ;;  %v652_v26 = vsel %vm487_vm4, %v3051_v36, 0.0  ;;  %v2299_v36 = vld [vmem:[#allocation11 + $0x10] sm:$0xff]  }
 0x8b3   :  { %v1348_v33 = vmul.f32 0.25, %v1339_v30  ;;  %v2295_v30 = vld [vmem:[#allocation11] sm:$0xff]  }
 0x8b4   :  { %v1351_v43 = vsel %vm670_vm9, %v1349_v52, -1e+30  ;;  %v649_v52 = vsel %vm487_vm4, %v2977_v23, 0.0  ;;  %2140 = vmatpush3.bf16.msra.mxu1 %v2295_v30  ;;  %v2300_v23 = vld [vmem:[#allocation13 + $0x10] sm:$0xff]  }
 0x8b5   :  { %v1355_v47 = vsel %vm487_vm4, %v1351_v43, -inf  ;;  %v1350_v46 = vsel %vm669_vm10, %v1348_v33, -1e+30  ;;  %v2296_v33 = vld [vmem:[#allocation13] sm:$0xff]   ;;  %2141 = vmatprep.subr.bf16.mxu1 %v2607_v8 }
 0x8b6   :  { %1356 = vmax.xlane.f32.xlu1 %v1355_v47  ;;  %v1352_v45 = vsel %vm487_vm4, %v1350_v46, -inf  ;;  %v2298_v47 = vld [vmem:[#allocation13 + $0x8] sm:$0xff]  }
 0x8b7   :  { %1353 = vmax.xlane.f32.xlu0 %v1352_v45  ;;  %v2302_v45 = vld [vmem:[#allocation13 + $0x18] sm:$0xff]  }
 0x8c7   :  { %2269 = vrot.lane.b32.xlu1 %v2268_v57, %s2613_s30 }
 0x943   :  { %v1357_v56 = vpop.xlane.xlu1 %1356 }
 0x944   :  { %v1359_v31 = vsub.f32 %v1351_v43, %v1357_v56  ;;  %v1354_v34 = vpop.xlane.xlu0 %1353  ;;  %v2297_v43 = vld [vmem:[#allocation11 + $0x8] sm:$0xff]  }
 0x945   :  { %v1358_v35 = vsub.f32 %v1350_v46, %v1354_v34  ;;  %2142 = vmatpush3.bf16.msra.mxu1 %v2297_v43  ;;  %v2301_v46 = vld [vmem:[#allocation11 + $0x18] sm:$0xff]  }
 0x946   :  { %v1362_v40 = vmul.f32 1.442695, %v1359_v31  ;;  %2143 = vmatprep.subr.bf16.mxu1 %v2607_v8 }
 0x947   :  { %v1360_v38 = vmul.f32 1.442695, %v1358_v35  ;;  %v2270_v1 = vpop.permute.xlu1 %2269 }
 0x948   :  { %v2272_v3 = vunpack.i.h.bf16 %v2270_v1  ;;  %v2271_v4 = vunpack.i.l.bf16 %v2270_v1  ;;  %v2308_v1 = vld [vmem:[%s3312_s14 + $0x28] sm:$0xff]  }
 0x949   :  { %2339 = vpow2.f32 %v1360_v38  ;;  %2144 = vmatpush3.bf16.msra.mxu1 %v2299_v36  ;;  %v658_v38 = vld [vmem:[#allocation14 + $0x8] sm:$0xff] }
 0x94a   :  { %2341 = vpow2.f32 %v1362_v40  ;;  %v1480_v9 = vsel %vm487_vm4, %v3116_v51, %v2272_v3  ;;  %v1479_v10 = vsel %vm487_vm4, %v3118_v53, %v2271_v4  ;;  %v2359_v53 = vld [vmem:[%s3320_s22] sm:$0xff]  ;;  %2145 = vmatprep.subr.bf16.mxu1 %v2607_v8  ;;  %v2310_v3 = vld [vmem:[%s3312_s14 + $0x38] sm:$0xff]  }
 0x94d   :  { %2146 = vmatpush3.bf16.msra.mxu1 %v2301_v46 }
 0x94e   :  { %2163 = vmatprep.subr.bf16.mxu1 %v2607_v8 }
 0x953   :  { %v2340_v20 = vpop.eup %2339 }
 0x954   :  { %v1364_v41 = vsel %vm487_vm4, %v2340_v20, 0.0  ;;  %v2342_v42 = vpop.eup %2341 }
 0x955   :  { %1365 = vadd.xlane.f32.xlu0 %v1364_v41  ;;  %v1367_v44 = vsel %vm487_vm4, %v2342_v42, 0.0 }
 0x959   :  { %1368 = vadd.xlane.f32.xlu0 %v1367_v44 }
 0x96f   :  { %2274 = vrot.lane.b32.xlu0 %v2273_v29, %s2615_s28 }
 0x9e2   :  { %v1366_v48 = vpop.xlane.xlu0 %1365 }
 0x9e3   :  { %2343 = vrcp.f32 %v1366_v48 }
 0x9e6   :  { %v1369_v49 = vpop.xlane.xlu0 %1368 }
 0x9e7   :  { %2345 = vrcp.f32 %v1369_v49 }
 0x9ea   :  { %v2275_v2 = vpop.permute.xlu0 %2274 }
 0x9eb   :  { %v2277_v5 = vunpack.i.h.bf16 %v2275_v2  ;;  %v2276_v6 = vunpack.i.l.bf16 %v2275_v2  ;;  %v2309_v2 = vld [vmem:[%s3312_s14 + $0x30] sm:$0xff]  }
 0x9ed   :  { %v2344_v50 = vpop.eup %2343  ;;  %v1482_v14 = vsel %vm490_vm6, %v1480_v9, %v2277_v5  ;;  %v1481_v15 = vsel %vm490_vm6, %v1479_v10, %v2276_v6 }
 0x9ee   :  { %v1372_v54 = vmul.f32 %v2344_v50, %v2340_v20 }
 0x9f0   :  { %2124 = vmatprep.mubr.msk.f32.mxu0 %vm487_vm4, %v1372_v54 }
 0x9f1   :  { %v2346_v55 = vpop.eup %2345 }
 0x9f2   :  { %v1373_v57 = vmul.f32 %v2346_v55, %v2342_v42  ;;  %v657_v42 = vld [vmem:[#allocation14] sm:$0xff] }
 0x9f4   :  { %2125 = vmatmul.mubr.msk.f32.vlgmr.msra.gmra.mrb[14].mxu0 %vm487_vm4, %v1373_v57  ;;  %v1949_v57 = vld [vmem:[#allocation7] ss:$0 sm:$0xff] }
 0x9f5   :  { %2135 = vmatprep.mubr.msk.bf16.mxu0 %vm2608_vm1, %v2607_v8  ;;  %2128 = vmatpush3.bf16.msra.mxu0 %v2291_v58 }
 0x9f6   :  { %2129 = vmatprep.subr.bf16.mxu0 %v2607_v8 }
 0x9f9   :  { %2130 = vmatpush3.bf16.msra.mxu0 %v2292_v59 }
 0x9fa   :  { %2131 = vmatprep.subr.bf16.mxu0 %v2607_v8 }
 0x9fd   :  { %2132 = vmatpush3.bf16.msra.mxu0 %v2293_v60 }
 0x9fe   :  { %2133 = vmatprep.subr.bf16.mxu0 %v2607_v8 }
 0xa01   :  { %2134 = vmatpush3.bf16.msra.mxu0 %v2294_v61 }
 0xa02   :  { %2151 = vmatprep.subr.bf16.mxu0 %v2607_v8 }
 0xac7   :  { %v2126_v32 = vpop.f32.mrb[14].mxu0 }
 0xac8   :  { %v1446_v63 = vpop.f32.mrb[15].mxu0 }
 0xac9   :  { %v2278_v0 = vpack.i.bf16 %v2126_v32, %v1446_v63  ;;  %v2305_v32 = vld [vmem:[%s3312_s14 + $0x10] sm:$0xff]   ;;  %v2306_v63 = vld [vmem:[%s3312_s14 + $0x18] sm:$0xff]  }
 0xacb   :  { %2279 = vrot.lane.b32.xlu1 %v2278_v0, %s2614_s25  ;;  %v2307_v0 = vld [vmem:[%s3312_s14 + $0x20] sm:$0xff]  }
 0xb3d   :  { %v2280_v7 = vpop.permute.xlu1 %2279 }
 0xb3e   :  { %v2282_v11 = vunpack.i.h.bf16 %v2280_v7  ;;  %v2281_v13 = vunpack.i.l.bf16 %v2280_v7 }
 0xb40   :  { %v1483_v37 = vsel %vm493_vm7, %v1481_v15, %v2281_v13  ;;  %v1484_v16 = vsel %vm493_vm7, %v1482_v14, %v2282_v11 }
 0xb41   :  { %v1493_v17 = vpack.c.bf16 %v1484_v16, %v1483_v37 }
 0xb43   :  { %2136 = vmatmul.mubr.msk.bf16.vlgmr.msra.gmra.mrb[16].mxu0 %vm168_vm0, %v1493_v17 }
 0xb44   :  { %2159 = vmatprep.mubr.msk.bf16.mxu0 %vm2608_vm1, %v2607_v8  ;;  %2152 = vmatpush3.bf16.msra.mxu0 %v2296_v33 }
 0xb45   :  { %2153 = vmatprep.subr.bf16.mxu0 %v2607_v8 }
 0xb48   :  { %2154 = vmatpush3.bf16.msra.mxu0 %v2298_v47 }
 0xb49   :  { %2155 = vmatprep.subr.bf16.mxu0 %v2607_v8 }
 0xb4c   :  { %2156 = vmatpush3.bf16.msra.mxu0 %v2300_v23 }
 0xb4d   :  { %2157 = vmatprep.subr.bf16.mxu0 %v2607_v8 }
 0xb50   :  { %2158 = vmatpush3.bf16.msra.mxu0 %v2302_v45 }
 0xc16   :  { %v1555_v51 = vpop.f32.mrb[16].mxu0 }
 0xc17   :  { %v3199_v18 = vadd.f32 %v2359_v53, %v1555_v51  ;;  %v2137_v19 = vpop.f32.mrb[17].mxu0 }
 0xc18   :  { %v1558_v22 = vpop.f32.mrb[18].mxu0 }
 0xc19   :  { %v3204_v12 = vadd.f32 %v2360_v62, %v1558_v22  ;;  %v2138_v24 = vpop.f32.mrb[19].mxu0  ;;  %v1565_v25 = vmul.f32 %v3199_v18, %v3199_v18 }
 0xc1b   :  { %v1567_v27 = vsel %vm168_vm0, %v1565_v25, 0.0  ;;  %v1566_v28 = vmul.f32 %v3204_v12, %v3204_v12 }
 0xc1c   :  { %1568 = vadd.xlane.f32.xlu1 %v1567_v27 }
 0xc1d   :  { %v1570_v29 = vsel %vm168_vm0, %v1566_v28, 0.0 }
 0xc1e   :  { %1571 = vadd.xlane.f32.xlu0 %v1570_v29 }
 0xc20   :  { %653 = vadd.xlane.f32.xlu1 %v652_v26 }
 0xc22   :  { %650 = vadd.xlane.f32.xlu0 %v649_v52 }
 0xca9   :  { %v1569_v56 = vpop.xlane.xlu1 %1568 }
 0xcaa   :  { %v1573_v31 = vmul.f32 0.015625, %v1569_v56 }
 0xcab   :  { %v1572_v34 = vpop.xlane.xlu0 %1571 }
 0xcac   :  { %v1575_v35 = vadd.f32 1e-06, %v1573_v31  ;;  %v1574_v40 = vmul.f32 0.015625, %v1572_v34 }
 0xcad   :  { %v654_v20 = vpop.xlane.xlu1 %653 }
 0xcae   :  { %2347 = vrsqrt.f32 %v1575_v35  ;;  %v1576_v41 = vadd.f32 1e-06, %v1574_v40  ;;  %vm656_vm11 = vcmp.gt.f32.partialorder %v654_v20, 0.0 }
 0xcaf   :  { %v664_v44 = vsel %vm656_vm11, %v3065_v21, %v658_v38  ;;  %v651_v48 = vpop.xlane.xlu0 %650  ;;  %v2303_v21 = vld [vmem:[%s3312_s14] sm:$0xff]  }
 0xcb0   :  { %2349 = vrsqrt.f32 %v1576_v41  ;;  %666 = vst.msk [vmem:[#allocation17 + $0x8] sm:$0xff] %vm168_vm0, %v664_v44  ;;  %vm655_vm12 = vcmp.gt.f32.partialorder %v651_v48, 0.0 }
 0xcb1   :  { %v663_v49 = vsel %vm655_vm12, %v3067_v39, %v657_v42  ;;  %v2304_v39 = vld [vmem:[%s3312_s14 + $0x8] sm:$0xff]   ;;  %s2619_s14 = smov [#allocation17]  }
 0xcb2   :  { %665 = vst.msk [vmem:[#allocation17] sm:$0xff] %vm168_vm0, %v663_v49  ;;  %s1882_s8 = sshll.u32 %s2619_s14, 4  ;;  %s1883_s8 = int_to_ptr.vmem [resolvable:$true] %s1882_s8 }
 0xcb3   :  { %s2537_s7 = scalar_lea.vmem %s1883_s8, 256  ;;  %p2542_p9 = scmp.lt.s32.totalorder %s1883_s8, %s1883_s8 }
 0xcb4   :  { %p2538_p8 = scmp.ne.s32.totalorder %s1883_s8, %s2537_s7  ;;  %p2543_p10 = scmp.lt.s32.totalorder %s2537_s7, %s2537_s7 }
 0xcb6   :  { %p2544_p11 = por %p2543_p10, %p2542_p9 }
 0xcb8   :  { %v2348_v50 = vpop.eup %2347  ;;  %p2545_p12 = pnand %p2544_p11, %p2538_p8 }
 0xcb9   :  { %v1579_v54 = vmul.f32 %v2348_v50, %v3199_v18 }
 0xcba   :  { %v2350_v55 = vpop.eup %2349 }
 0xcbb   :  { %v1580_v58 = vmul.f32 %v2350_v55, %v3204_v12  ;;  %v1587_v59 = vmul.f32 %v1949_v57, %v1579_v54 }
 0xcbd   :  { %v1588_v60 = vmul.f32 %v1949_v57, %v1580_v58 }
 0xcbf   :  { %v1597_v61 = vpack.c.bf16 %v1588_v60, %v1587_v59 }
 0xcc1   :  { %2148 = vmatmul.mubr.msk.bf16.vlgmr.msra.gmra.mrb[12].mxu1 %vm168_vm0, %v1597_v61  ;;  %2160 = vmatmul.mubr.msk.bf16.vlgmr.msra.gmra.mrb[20].mxu0 %vm168_vm0, %v1597_v61 }
 0xcc2   :  { %2179 = vmatprep.mubr.msk.bf16.mxu1 %vm2608_vm1, %v2607_v8  ;;  %2164 = vmatpush3.bf16.msra.mxu1 %v2303_v21 }
 0xcc3   :  { %2165 = vmatprep.subr.bf16.mxu1 %v2607_v8 }
 0xcc6   :  { %2166 = vmatpush3.bf16.msra.mxu1 %v2304_v39 }
 0xcc7   :  { %2167 = vmatprep.subr.bf16.mxu1 %v2607_v8 }
 0xcca   :  { %2168 = vmatpush3.bf16.msra.mxu1 %v2305_v32 }
 0xccb   :  { %2169 = vmatprep.subr.bf16.mxu1 %v2607_v8 }
 0xcce   :  { %2170 = vmatpush3.bf16.msra.mxu1 %v2306_v63 }
 0xccf   :  { %2171 = vmatprep.subr.bf16.mxu1 %v2607_v8 }
 0xcd2   :  { %2172 = vmatpush3.bf16.msra.mxu1 %v2307_v0 }
 0xcd3   :  { %2173 = vmatprep.subr.bf16.mxu1 %v2607_v8 }
 0xcd6   :  { %2174 = vmatpush3.bf16.msra.mxu1 %v2308_v1 }
 0xcd7   :  { %2175 = vmatprep.subr.bf16.mxu1 %v2607_v8 }
 0xcda   :  { %2176 = vmatpush3.bf16.msra.mxu1 %v2309_v2 }
 0xcdb   :  { %2177 = vmatprep.subr.bf16.mxu1 %v2607_v8 }
 0xcde   :  { %2178 = vmatpush3.bf16.msra.mxu1 %v2310_v3 }
 0xd94   :  { %v1659_v4 = vpop.f32.mrb[12].mxu1  ;;  %v1732_v5 = vpop.f32.mrb[20].mxu0 }
 0xd95   :  { %v1960_v6 = vmul.f32 -1.442695, %v1659_v4  ;;  %v2149_v7 = vpop.f32.mrb[13].mxu1  ;;  %v2161_v9 = vpop.f32.mrb[21].mxu0 }
 0xd96   :  { %v1662_v10 = vpop.f32.mrb[14].mxu1  ;;  %v1735_v11 = vpop.f32.mrb[22].mxu0 }
 0xd97   :  { %2351 = vpow2.f32 %v1960_v6  ;;  %v1961_v13 = vmul.f32 -1.442695, %v1662_v10  ;;  %v2150_v14 = vpop.f32.mrb[15].mxu1  ;;  %v2162_v15 = vpop.f32.mrb[23].mxu0 }
 0xd99   :  { %2353 = vpow2.f32 %v1961_v13 }
 0xda1   :  { %v2352_v37 = vpop.eup %2351 }
 0xda2   :  { %v1745_v16 = vadd.f32 1.0, %v2352_v37 }
 0xda3   :  { %v2354_v8 = vpop.eup %2353 }
 0xda4   :  { %2355 = vrcp.f32 %v1745_v16  ;;  %v1746_v17 = vadd.f32 1.0, %v2354_v8 }
 0xda6   :  { %2357 = vrcp.f32 %v1746_v17 }
 0xdae   :  { %v2356_v51 = vpop.eup %2355 }
 0xdaf   :  { %v1751_v53 = vmul.f32 %v2356_v51, %v1659_v4 }
 0xdb0   :  { %v2358_v19 = vpop.eup %2357 }
 0xdb1   :  { %v1753_v22 = vmul.f32 %v1751_v53, %v1732_v5  ;;  %v1752_v62 = vmul.f32 %v2358_v19, %v1662_v10 }
 0xdb3   :  { %v1754_v24 = vmul.f32 %v1752_v62, %v1735_v11 }
 0xdb5   :  { %v1771_v25 = vpack.c.bf16 %v1754_v24, %v1753_v22 }
 0xdb7   :  { %2180 = vmatmul.mubr.bf16.vlgmr.msra.gmra.mrb[16].mxu1 %v1771_v25 }
 0xdb8   :  { %2548 = shalt.err (!%p2545_p12)
}
 0xdb9   :  { %s2549_s5 = scalar_lea.hbm %s3315_s17, 256 }
 0xdba   :  { %p2550_p13 = scmp.ne.s32.totalorder %s3315_s17, %s2549_s5  ;;  %p2553_p0 = scmp.lt.u32.totalorder %s2549_s5, %s3315_s17 }
 0xdbc   :  { %p2555_p1 = pnand %p2553_p0, %p2550_p13 }
 0xdbe   :  { %2558 = shalt.err (!%p2555_p1)
}
 0xdbf   :  { %1888 = dma.vmem_to_hbm [thread:$0]  %s1883_s8, 256, %s3315_s17, [#allocation18], %s2601_s12, %s2601_s12, %s2602_s21  }
 0xdc0   :  { %s2620_s26 = smov [#allocation16]  }
 0xdc1   :  { %s1870_s10 = sshll.u32 %s2620_s26, 4  ;;  %s1871_s10 = int_to_ptr.vmem [resolvable:$true] %s1870_s10 }
 0xdc2   :  { %s2559_s25 = scalar_lea.vmem %s1871_s10, 256  ;;  %p2564_p3 = scmp.lt.s32.totalorder %s1871_s10, %s1871_s10 }
 0xdc3   :  { %p2560_p2 = scmp.ne.s32.totalorder %s1871_s10, %s2559_s25  ;;  %p2565_p4 = scmp.lt.s32.totalorder %s2559_s25, %s2559_s25 }
 0xdc5   :  { %p2566_p5 = por %p2565_p4, %p2564_p3 }
 0xdc7   :  { %p2567_p6 = pnand %p2566_p5, %p2560_p2 }
 0xe8a   :  { %v1854_v27 = vpop.f32.mrb[16].mxu1 }
 0xe8b   :  { %v1861_v28 = vadd.f32 %v1854_v27, %v3199_v18  ;;  %v2181_v29 = vpop.f32.mrb[17].mxu1 }
 0xe8c   :  { %v1857_v26 = vpop.f32.mrb[18].mxu1 }
 0xe8d   :  { %1863 = vst.msk [vmem:[#allocation16] sm:$0xff] %vm168_vm0, %v1861_v28  ;;  %v1862_v52 = vadd.f32 %v1857_v26, %v3204_v12  ;;  %v2182_v30 = vpop.f32.mrb[19].mxu1 }
 0xe8f   :  { %1864 = vst.msk [vmem:[#allocation16 + $0x8] sm:$0xff] %vm168_vm0, %v1862_v52 }
 0xe90   :  { %2570 = shalt.err (!%p2567_p6)
}
 0xe91   :  { %s2571_s29 = scalar_lea.hbm %s3314_s16, 256 }
 0xe92   :  { %p2572_p7 = scmp.ne.s32.totalorder %s3314_s16, %s2571_s29  ;;  %p2575_p8 = scmp.lt.u32.totalorder %s2571_s29, %s3314_s16 }
 0xe94   :  { %p2577_p9 = pnand %p2575_p8, %p2572_p7 }
 0xe96   :  { %2580 = shalt.err (!%p2577_p9)
}
 0xe97   :  { %1876 = dma.vmem_to_hbm [thread:$0]  %s1871_s10, 256, %s3314_s16, [#allocation4], %s2601_s12, %s2601_s12, %s2602_s21  }
 0xe98   :  { %2591 = dma.done.wait [#allocation4], 256  }
 0xe99   :  { %2592 = vsyncadd [#allocation4], 4294967040 }
 0xe9a   :  { %2593 = dma.done.wait [#allocation18], 256  }
 0xe9b   :  { %2594 = vsyncadd [#allocation18], 4294967040 }
 0xe9c   :  { %1895 = vsyncpa [#allocation3], 1 }
 0xe9d   :  { %1896 = vsyncpa [#allocation6], 1 }
 0xe9e   :  { %1897 = vsyncpa [#allocation9], 1 }
 0xe9f   :  { %1898 = vsyncpa [#allocation12], 1 }
 0xea0   :  { %1899 = vsyncpa [#allocation15], 1 }
 0xea1   :  { %1900 = vsyncpa [#allocation4], 1 }
 0xea2   :  { %1901 = vsyncpa [#allocation18], 1 }

</bundles_post_ra>
